<compile_context>
chip_gen: v6e
topology: v6e:2x2x1
jax: 0.10.0
libtpu: 0.0.40
codegen_flags: <defaults>
</compile_context>

<pallas_src>
import jax
import jax.numpy as jnp
from jax import lax
from jax.experimental import pallas as pl
from jax.experimental.pallas import tpu as pltpu

EPS = 1e-5           # nn.InstanceNorm2d default (affine=False, biased variance)
LRELU_SLOPE = 0.01   # nn.LeakyReLU default negative_slope
W_LEFT = 8           # sublane-aligned start of the interior inside the padded halo scratch

# TODO(synk): Dropout2d(p=0.0) is an exact identity, so it is omitted from the kernel.
# TODO(synk): only the DownScale block is implemented here; the other UNet blocks (input ConvBlock,
#             UpScale/ConvTranspose, AttentionGate, 1x1 output conv + sigmoid) reuse the same
#             fused conv-block pattern and are not included in this script.


def _downscale_forward(x_nchw, w1, w2, compute_dtype=jnp.float32, out_dtype=None):
    """Fused DownScale forward.

    x_nchw: (N, Cin, H, W) PyTorch layout, H and W even.
    w1:     (Cmid, Cin, 3, 3)   conv1 weight (bias=False)
    w2:     (Cout, Cmid, 3, 3)  conv2 weight (bias=False)
    returns (N, Cout, H//2, W//2)

    compute_dtype: dtype of the MXU operands and the VMEM activation scratch (float32 for exact
    parity with the PyTorch module; bfloat16 for the fast MXU path on every TPU generation).
    Accumulation, InstanceNorm statistics and LeakyReLU are always f32.
    out_dtype: output array dtype (defaults to the input dtype).
    """
    N, Cin, H, W = x_nchw.shape
    Cmid = w1.shape[0]
    Cout = w2.shape[0]
    assert w1.shape == (Cmid, Cin, 3, 3) and w2.shape == (Cout, Cmid, 3, 3)
    assert H % 2 == 0 and W % 2 == 0
    Ho, Wo = H // 2, W // 2
    HW = Ho * Wo
    Hp = Ho + 2                       # 1-row halo top/bottom (outer dim -> offsets are free)
    Wp = W_LEFT + Wo + 8              # interior at cols [W_LEFT, W_LEFT+Wo); halo cols W_LEFT-1 / W_LEFT+Wo
    inv_hw = 1.0 / float(HW)
    out_dtype = x_nchw.dtype if out_dtype is None else out_dtype

    # ---- glue (ONE fused XLA pass): the mandatory NCHW->NHWC layout change merged with the
    # 2x2 pool-corner gather.  For an NCHW interface this is the minimal pre-pass (one read of x,
    # one write of the same element count); reading raw NCHW blocks inside the kernel would save
    # that round trip but needs an in-kernel (Cin,H,W)->(Ho,Wo,Cin) relayout.
    # TODO(synk): in an NHWC end-to-end model, drop this pre-pass and do the 2x2 max in-kernel on
    #             (1, H, W, C) blocks via strided sublane reads.
    xg = (x_nchw.reshape(N, Cin, Ho, 2, Wo, 2)
                .transpose(0, 3, 5, 2, 4, 1)            # (N, 2, 2, Ho, Wo, Cin)
                .reshape(N, 4, Ho, Wo, Cin))

    # ---- glue: per-tap weight matrices, tap index t = 3*ky + kx, each (C, Cout).
    w1t = jnp.transpose(w1, (2, 3, 1, 0)).reshape(9, Cin, Cmid).astype(compute_dtype)
    w2t = jnp.transpose(w2, (2, 3, 1, 0)).reshape(9, Cmid, Cout).astype(compute_dtype)

    def kernel(xg_ref, w1_ref, w2_ref, o_ref, xp1_ref, xp2_ref):
        # xg_ref: (1, 4, Ho, Wo, Cin); w*_ref: (9, C, Cout); o_ref: (1, Ho*Wo, Cout)
        # xp1_ref / xp2_ref: zero-bordered padded activation scratch (Hp, Wp, C), compute_dtype.

        def zero_halo(xp_ref):
            # Border-only zeroing: the interior is fully overwritten every grid step, and scratch
            # persists across steps (per-core copy with megacore), so re-zero only the read halo.
            c = xp_ref.shape[-1]
            zrow = jnp.zeros((1, Wp, c), xp_ref.dtype)
            xp_ref[0:1, :, :] = zrow
            xp_ref[Ho + 1:Ho + 2, :, :] = zrow
            zcol = jnp.zeros((Hp, 1, c), xp_ref.dtype)
            xp_ref[:, W_LEFT - 1:W_LEFT, :] = zcol
            xp_ref[:, W_LEFT + Wo:W_LEFT + Wo + 1, :] = zcol

        def conv3x3(xp_ref, w_ref):
            # Shift-and-accumulate conv: 9 (HW, C) x (C, Cout) MXU matmuls summed into one f32
            # accumulator.  Only 3 W-shifted slab loads (kx); ky is an outer-dim slice (free).
            # No (HW, 9C) patches buffer, no lane-axis concat.
            c = xp_ref.shape[-1]
            acc = None
            for kx in range(3):
                col0 = W_LEFT - 1 + kx
                slab = xp_ref[:, col0:col0 + Wo, :]                 # (Hp, Wo, c)
                for ky in range(3):
                    lhs = slab[ky:ky + Ho].reshape(HW, c)
                    part = jnp.dot(lhs, w_ref[3 * ky + kx],
                                   preferred_element_type=jnp.float32)
                    acc = part if acc is None else acc + part
            return acc                                              # (HW, Cout) f32

        def inst_norm_lrelu(y):
            # InstanceNorm2d (affine=False, biased variance, eps=1e-5), centred two-pass form,
            # then LeakyReLU(0.01).  All f32.
            mean = jnp.sum(y, axis=0, keepdims=True) * inv_hw
            yc = y - mean
            var = jnp.sum(yc * yc, axis=0, keepdims=True) * inv_hw
            yn = yc * lax.rsqrt(var + EPS)
            return jnp.where(yn >= 0, yn, LRELU_SLOPE * yn)

        # --- 2x2 max pool: the 4 window corners were gathered by the layout pre-pass ---
        pooled = jnp.maximum(jnp.maximum(xg_ref[0, 0], xg_ref[0, 1]),
                             jnp.maximum(xg_ref[0, 2], xg_ref[0, 3]))   # (Ho, Wo, Cin)

        zero_halo(xp1_ref)
        zero_halo(xp2_ref)
        xp1_ref[1:Ho + 1, W_LEFT:W_LEFT + Wo, :] = pooled.astype(xp1_ref.dtype)

        # conv1 -> norm1 -> act1 (-> dropout p=0)
        y1 = inst_norm_lrelu(conv3x3(xp1_ref, w1_ref))                  # (HW, Cmid) f32
        xp2_ref[1:Ho + 1, W_LEFT:W_LEFT + Wo, :] = (
            y1.reshape(Ho, Wo, Cmid).astype(xp2_ref.dtype))

        # conv2 -> norm2 -> act2 (-> dropout p=0)
        y2 = inst_norm_lrelu(conv3x3(xp2_ref, w2_ref))                  # (HW, Cout) f32
        o_ref[0] = y2.astype(o_ref.dtype)

    # ---- VMEM budget computed from actual block / scratch sizes (was hard-coded 32 MiB).
    isz_in = jnp.dtype(x_nchw.dtype).itemsize
    isz_c = jnp.dtype(compute_dtype).itemsize
    isz_out = jnp.dtype(out_dtype).itemsize
    block_in = 4 * Ho * Wo * Cin * isz_in
    block_out = HW * Cout * isz_out
    w_bytes = 9 * (Cin * Cmid + Cmid * Cout) * isz_c
    scratch_bytes = Hp * Wp * (Cin + Cmid) * isz_c
    work_bytes = HW * (Cmid + Cout) * 4 + Hp * Wo * max(Cin, Cmid) * isz_c
    est = 2 * (block_in + block_out + w_bytes) + scratch_bytes + 2 * work_bytes
    # v5e/v6e: 128 MiB physical (default scoped limit only 16/32 MiB, so set it explicitly).
    # v7x: 64 MiB physical -> switch to the row-band two-pass path (TODO above) near that.
    vmem_limit = int(min(max(2 * est, 16 * 1024 * 1024), 100 * 1024 * 1024))

    cost = pl.CostEstimate(
        flops=2 * N * HW * 9 * (Cin * Cmid + Cmid * Cout),
        transcendentals=N * (Cmid + Cout),                 # rsqrt per (image, channel)
        bytes_accessed=(xg.size * isz_in + (w1t.size + w2t.size) * isz_c
                        + N * HW * Cout * isz_out),
    )

    out = pl.pallas_call(
        kernel,
        out_shape=jax.ShapeDtypeStruct((N, HW, Cout), out_dtype),
        grid=(N,),
        in_specs=[
            pl.BlockSpec((1, 4, Ho, Wo, Cin), lambda n: (n, 0, 0, 0, 0)),
            pl.BlockSpec((9, Cin, Cmid), lambda n: (0, 0, 0)),
            pl.BlockSpec((9, Cmid, Cout), lambda n: (0, 0, 0)),
        ],
        out_specs=pl.BlockSpec((1, HW, Cout), lambda n: (n, 0, 0)),
        scratch_shapes=[
            pltpu.VMEM((Hp, Wp, Cin), compute_dtype),
            pltpu.VMEM((Hp, Wp, Cmid), compute_dtype),
        ],
        compiler_params=pltpu.CompilerParams(
            dimension_semantics=("parallel",),   # batch axis -> megacore / both v7x TensorCores
            vmem_limit_bytes=vmem_limit,
        ),
        cost_estimate=cost,
    )(xg, w1t, w2t)

    # ---- glue (one pass): back to the PyTorch NCHW interface.  Skip this transpose (and keep the
    # NHWC / (N, Ho*Wo, Cout) layout) when composing DownScale blocks inside a full NHWC model.
    return out.reshape(N, Ho, Wo, Cout).transpose(0, 3, 1, 2)


downscale_forward = jax.jit(_downscale_forward, static_argnames=("compute_dtype", "out_dtype"))


# ------------------------------------------------------------------ pure-JAX reference
def downscale_reference(x, w1, w2):
    N, C, H, W = x.shape
    p = x.reshape(N, C, H // 2, 2, W // 2, 2).max(axis=(3, 5))

    def block(y, w):
        y = lax.conv_general_dilated(y, w, window_strides=(1, 1), padding="SAME",
                                     dimension_numbers=("NCHW", "OIHW", "NCHW"))
        m = y.mean(axis=(2, 3), keepdims=True)
        v = ((y - m) ** 2).mean(axis=(2, 3), keepdims=True)
        y = (y - m) / jnp.sqrt(v + EPS)
        return jnp.where(y >= 0, y, LRELU_SLOPE * y)

    return block(block(p, w1), w2)


if __name__ == "__main__":
    N, Cin, Cout, H, W = 2, 4, 8, 16, 16

    key = jax.random.PRNGKey(0)
    kx_, k1, k2 = jax.random.split(key, 3)
    x = jax.random.normal(kx_, (N, Cin, H, W), dtype=jnp.float32)
    # Deterministic synthetic parameters (Conv2d weights, bias=False; InstanceNorm has no affine).
    w1 = 0.1 * jax.random.normal(k1, (Cout, Cin, 3, 3), dtype=jnp.float32)
    w2 = 0.1 * jax.random.normal(k2, (Cout, Cout, 3, 3), dtype=jnp.float32)

    ref = jax.block_until_ready(downscale_reference(x, w1, w2))

    # f32 operands + f32 scratch: exact parity with the PyTorch module.
    out = jax.block_until_ready(downscale_forward(x, w1, w2))
    assert out.shape == (N, Cout, H // 2, W // 2), out.shape
    max_err = float(jnp.max(jnp.abs(out - ref)))
    assert max_err < 1e-3, f"f32 path mismatch vs reference: {max_err}"

    # bf16 MXU operands + bf16 activation scratch (fast path on all generations); accumulation and
    # InstanceNorm stay f32.  Loose sanity bound only — the reference stays in f32.
    out_bf16 = jax.block_until_ready(downscale_forward(x, w1, w2, compute_dtype=jnp.bfloat16))
    max_err_bf16 = float(jnp.max(jnp.abs(out_bf16.astype(jnp.float32) - ref)))
    assert max_err_bf16 < 2e-1, f"bf16 path mismatch vs reference: {max_err_bf16}"

    print("KERNEL_OK")
</pallas_src>

<mosaic_0001>
module attributes {stable_mosaic.version = 11 : i64} {
  func.func @kernel(%arg0: i32, %arg1: memref<1x4x8x8x4xf32, #tpu.memory_space<vmem>>, %arg2: memref<9x4x8xf32, #tpu.memory_space<vmem>>, %arg3: memref<9x8x8xf32, #tpu.memory_space<vmem>>, %arg4: memref<1x64x8xf32, #tpu.memory_space<vmem>>, %arg5: memref<10x24x4xf32, #tpu.memory_space<vmem>>, %arg6: memref<10x24x8xf32, #tpu.memory_space<vmem>>) attributes {dimension_semantics = [#tpu.dimension_semantics<parallel>], iteration_bounds = array<i64: 2>, scalar_prefetch = 0 : i64, scratch_operands = 2 : i64, tpu.core_type = #tpu.core_type<tc>, window_params = [{transform_indices = @transform_0, window_bounds = array<i64: 1, 4, 8, 8, 4>}, {pipeline_mode = #tpu.pipeline_mode<synchronous>, transform_indices = @transform_1, window_bounds = array<i64: 9, 4, 8>}, {pipeline_mode = #tpu.pipeline_mode<synchronous>, transform_indices = @transform_2, window_bounds = array<i64: 9, 8, 8>}, {transform_indices = @transform_3, window_bounds = array<i64: 1, 64, 8>}]} {
    %c0 = arith.constant 0 : index
    %c0_0 = arith.constant 0 : index
    %c0_1 = arith.constant 0 : index
    %c0_2 = arith.constant 0 : index
    %c0_3 = arith.constant 0 : index
    %0 = vector.load %arg1[%c0, %c0_0, %c0_1, %c0_2, %c0_3] : memref<1x4x8x8x4xf32, #tpu.memory_space<vmem>>, vector<1x1x8x8x4xf32>
    %1 = vector.shape_cast %0 : vector<1x1x8x8x4xf32> to vector<8x8x4xf32>
    %c0_4 = arith.constant 0 : index
    %c1 = arith.constant 1 : index
    %c0_5 = arith.constant 0 : index
    %c0_6 = arith.constant 0 : index
    %c0_7 = arith.constant 0 : index
    %2 = vector.load %arg1[%c0_4, %c1, %c0_5, %c0_6, %c0_7] : memref<1x4x8x8x4xf32, #tpu.memory_space<vmem>>, vector<1x1x8x8x4xf32>
    %3 = vector.shape_cast %2 : vector<1x1x8x8x4xf32> to vector<8x8x4xf32>
    %4 = arith.maximumf %1, %3 : vector<8x8x4xf32>
    %c0_8 = arith.constant 0 : index
    %c2 = arith.constant 2 : index
    %c0_9 = arith.constant 0 : index
    %c0_10 = arith.constant 0 : index
    %c0_11 = arith.constant 0 : index
    %5 = vector.load %arg1[%c0_8, %c2, %c0_9, %c0_10, %c0_11] : memref<1x4x8x8x4xf32, #tpu.memory_space<vmem>>, vector<1x1x8x8x4xf32>
    %6 = vector.shape_cast %5 : vector<1x1x8x8x4xf32> to vector<8x8x4xf32>
    %c0_12 = arith.constant 0 : index
    %c3 = arith.constant 3 : index
    %c0_13 = arith.constant 0 : index
    %c0_14 = arith.constant 0 : index
    %c0_15 = arith.constant 0 : index
    %7 = vector.load %arg1[%c0_12, %c3, %c0_13, %c0_14, %c0_15] : memref<1x4x8x8x4xf32, #tpu.memory_space<vmem>>, vector<1x1x8x8x4xf32>
    %8 = vector.shape_cast %7 : vector<1x1x8x8x4xf32> to vector<8x8x4xf32>
    %9 = arith.maximumf %6, %8 : vector<8x8x4xf32>
    %10 = arith.maximumf %4, %9 : vector<8x8x4xf32>
    %cst = arith.constant 0.000000e+00 : f32
    %11 = vector.broadcast %cst : f32 to vector<1x24x4xf32>
    %c0_16 = arith.constant 0 : index
    %c0_17 = arith.constant 0 : index
    %c0_18 = arith.constant 0 : index
    %12 = vector.load %arg5[%c0_16, %c0_17, %c0_18] : memref<10x24x4xf32, #tpu.memory_space<vmem>>, vector<1x24x4xf32>
    tpu.vector_store %arg5[%c0_16, %c0_17, %c0_18], %11 {strides = array<i32>} : memref<10x24x4xf32, #tpu.memory_space<vmem>>, vector<1x24x4xf32>,
    %c9 = arith.constant 9 : index
    %c0_19 = arith.constant 0 : index
    %c0_20 = arith.constant 0 : index
    %13 = vector.load %arg5[%c9, %c0_19, %c0_20] : memref<10x24x4xf32, #tpu.memory_space<vmem>>, vector<1x24x4xf32>
    tpu.vector_store %arg5[%c9, %c0_19, %c0_20], %11 {strides = array<i32>} : memref<10x24x4xf32, #tpu.memory_space<vmem>>, vector<1x24x4xf32>,
    %cst_21 = arith.constant 0.000000e+00 : f32
    %14 = vector.broadcast %cst_21 : f32 to vector<10x1x4xf32>
    %c0_22 = arith.constant 0 : index
    %c7 = arith.constant 7 : index
    %c0_23 = arith.constant 0 : index
    %15 = vector.load %arg5[%c0_22, %c7, %c0_23] : memref<10x24x4xf32, #tpu.memory_space<vmem>>, vector<10x1x4xf32>
    tpu.vector_store %arg5[%c0_22, %c7, %c0_23], %14 {strides = array<i32>} : memref<10x24x4xf32, #tpu.memory_space<vmem>>, vector<10x1x4xf32>,
    %c0_24 = arith.constant 0 : index
    %c16 = arith.constant 16 : index
    %c0_25 = arith.constant 0 : index
    %16 = vector.load %arg5[%c0_24, %c16, %c0_25] : memref<10x24x4xf32, #tpu.memory_space<vmem>>, vector<10x1x4xf32>
    tpu.vector_store %arg5[%c0_24, %c16, %c0_25], %14 {strides = array<i32>} : memref<10x24x4xf32, #tpu.memory_space<vmem>>, vector<10x1x4xf32>,
    %cst_26 = arith.constant 0.000000e+00 : f32
    %17 = vector.broadcast %cst_26 : f32 to vector<1x24x8xf32>
    %c0_27 = arith.constant 0 : index
    %c0_28 = arith.constant 0 : index
    %c0_29 = arith.constant 0 : index
    %18 = vector.load %arg6[%c0_27, %c0_28, %c0_29] : memref<10x24x8xf32, #tpu.memory_space<vmem>>, vector<1x24x8xf32>
    tpu.vector_store %arg6[%c0_27, %c0_28, %c0_29], %17 {strides = array<i32>} : memref<10x24x8xf32, #tpu.memory_space<vmem>>, vector<1x24x8xf32>,
    %c9_30 = arith.constant 9 : index
    %c0_31 = arith.constant 0 : index
    %c0_32 = arith.constant 0 : index
    %19 = vector.load %arg6[%c9_30, %c0_31, %c0_32] : memref<10x24x8xf32, #tpu.memory_space<vmem>>, vector<1x24x8xf32>
    tpu.vector_store %arg6[%c9_30, %c0_31, %c0_32], %17 {strides = array<i32>} : memref<10x24x8xf32, #tpu.memory_space<vmem>>, vector<1x24x8xf32>,
    %cst_33 = arith.constant 0.000000e+00 : f32
    %20 = vector.broadcast %cst_33 : f32 to vector<10x1x8xf32>
    %c0_34 = arith.constant 0 : index
    %c7_35 = arith.constant 7 : index
    %c0_36 = arith.constant 0 : index
    %21 = vector.load %arg6[%c0_34, %c7_35, %c0_36] : memref<10x24x8xf32, #tpu.memory_space<vmem>>, vector<10x1x8xf32>
    tpu.vector_store %arg6[%c0_34, %c7_35, %c0_36], %20 {strides = array<i32>} : memref<10x24x8xf32, #tpu.memory_space<vmem>>, vector<10x1x8xf32>,
    %c0_37 = arith.constant 0 : index
    %c16_38 = arith.constant 16 : index
    %c0_39 = arith.constant 0 : index
    %22 = vector.load %arg6[%c0_37, %c16_38, %c0_39] : memref<10x24x8xf32, #tpu.memory_space<vmem>>, vector<10x1x8xf32>
    tpu.vector_store %arg6[%c0_37, %c16_38, %c0_39], %20 {strides = array<i32>} : memref<10x24x8xf32, #tpu.memory_space<vmem>>, vector<10x1x8xf32>,
    %c1_40 = arith.constant 1 : index
    %c8 = arith.constant 8 : index
    %c0_41 = arith.constant 0 : index
    %23 = vector.load %arg5[%c1_40, %c8, %c0_41] : memref<10x24x4xf32, #tpu.memory_space<vmem>>, vector<8x8x4xf32>
    tpu.vector_store %arg5[%c1_40, %c8, %c0_41], %10 {strides = array<i32>} : memref<10x24x4xf32, #tpu.memory_space<vmem>>, vector<8x8x4xf32>,
    %c0_42 = arith.constant 0 : index
    %c7_43 = arith.constant 7 : index
    %c0_44 = arith.constant 0 : index
    %24 = vector.load %arg5[%c0_42, %c7_43, %c0_44] : memref<10x24x4xf32, #tpu.memory_space<vmem>>, vector<10x8x4xf32>
    %25 = vector.extract_strided_slice %24 {offsets = [0, 0, 0], sizes = [8, 8, 4], strides = [1, 1, 1]} : vector<10x8x4xf32> to vector<8x8x4xf32>
    %26 = vector.shape_cast %25 : vector<8x8x4xf32> to vector<64x4xf32>
    %c0_45 = arith.constant 0 : index
    %c0_46 = arith.constant 0 : index
    %c0_47 = arith.constant 0 : index
    %27 = vector.load %arg2[%c0_45, %c0_46, %c0_47] : memref<9x4x8xf32, #tpu.memory_space<vmem>>, vector<1x4x8xf32>
    %28 = vector.shape_cast %27 : vector<1x4x8xf32> to vector<4x8xf32>
    %cst_48 = arith.constant dense<0.000000e+00> : vector<64x8xf32>
    %29 = tpu.matmul %26, %28, %cst_48 {dimension_numbers = #tpu.dot_dimension_numbers<[1], [0], [0], [1], [0, 0, 1, 1], [], []>} : vector<64x4xf32>, vector<4x8xf32>, vector<64x8xf32> -> vector<64x8xf32>
    %30 = vector.extract_strided_slice %24 {offsets = [1, 0, 0], sizes = [8, 8, 4], strides = [1, 1, 1]} : vector<10x8x4xf32> to vector<8x8x4xf32>
    %31 = vector.shape_cast %30 : vector<8x8x4xf32> to vector<64x4xf32>
    %c3_49 = arith.constant 3 : index
    %c0_50 = arith.constant 0 : index
    %c0_51 = arith.constant 0 : index
    %32 = vector.load %arg2[%c3_49, %c0_50, %c0_51] : memref<9x4x8xf32, #tpu.memory_space<vmem>>, vector<1x4x8xf32>
    %33 = vector.shape_cast %32 : vector<1x4x8xf32> to vector<4x8xf32>
    %cst_52 = arith.constant dense<0.000000e+00> : vector<64x8xf32>
    %34 = tpu.matmul %31, %33, %cst_52 {dimension_numbers = #tpu.dot_dimension_numbers<[1], [0], [0], [1], [0, 0, 1, 1], [], []>} : vector<64x4xf32>, vector<4x8xf32>, vector<64x8xf32> -> vector<64x8xf32>
    %35 = arith.addf %29, %34 : vector<64x8xf32>
    %36 = vector.extract_strided_slice %24 {offsets = [2, 0, 0], sizes = [8, 8, 4], strides = [1, 1, 1]} : vector<10x8x4xf32> to vector<8x8x4xf32>
    %37 = vector.shape_cast %36 : vector<8x8x4xf32> to vector<64x4xf32>
    %c6 = arith.constant 6 : index
    %c0_53 = arith.constant 0 : index
    %c0_54 = arith.constant 0 : index
    %38 = vector.load %arg2[%c6, %c0_53, %c0_54] : memref<9x4x8xf32, #tpu.memory_space<vmem>>, vector<1x4x8xf32>
    %39 = vector.shape_cast %38 : vector<1x4x8xf32> to vector<4x8xf32>
    %cst_55 = arith.constant dense<0.000000e+00> : vector<64x8xf32>
    %40 = tpu.matmul %37, %39, %cst_55 {dimension_numbers = #tpu.dot_dimension_numbers<[1], [0], [0], [1], [0, 0, 1, 1], [], []>} : vector<64x4xf32>, vector<4x8xf32>, vector<64x8xf32> -> vector<64x8xf32>
    %41 = arith.addf %35, %40 : vector<64x8xf32>
    %c0_56 = arith.constant 0 : index
    %c8_57 = arith.constant 8 : index
    %c0_58 = arith.constant 0 : index
    %42 = vector.load %arg5[%c0_56, %c8_57, %c0_58] : memref<10x24x4xf32, #tpu.memory_space<vmem>>, vector<10x8x4xf32>
    %43 = vector.extract_strided_slice %42 {offsets = [0, 0, 0], sizes = [8, 8, 4], strides = [1, 1, 1]} : vector<10x8x4xf32> to vector<8x8x4xf32>
    %44 = vector.shape_cast %43 : vector<8x8x4xf32> to vector<64x4xf32>
    %c1_59 = arith.constant 1 : index
    %c0_60 = arith.constant 0 : index
    %c0_61 = arith.constant 0 : index
    %45 = vector.load %arg2[%c1_59, %c0_60, %c0_61] : memref<9x4x8xf32, #tpu.memory_space<vmem>>, vector<1x4x8xf32>
    %46 = vector.shape_cast %45 : vector<1x4x8xf32> to vector<4x8xf32>
    %cst_62 = arith.constant dense<0.000000e+00> : vector<64x8xf32>
    %47 = tpu.matmul %44, %46, %cst_62 {dimension_numbers = #tpu.dot_dimension_numbers<[1], [0], [0], [1], [0, 0, 1, 1], [], []>} : vector<64x4xf32>, vector<4x8xf32>, vector<64x8xf32> -> vector<64x8xf32>
    %48 = arith.addf %41, %47 : vector<64x8xf32>
    %49 = vector.extract_strided_slice %42 {offsets = [1, 0, 0], sizes = [8, 8, 4], strides = [1, 1, 1]} : vector<10x8x4xf32> to vector<8x8x4xf32>
    %50 = vector.shape_cast %49 : vector<8x8x4xf32> to vector<64x4xf32>
    %c4 = arith.constant 4 : index
    %c0_63 = arith.constant 0 : index
    %c0_64 = arith.constant 0 : index
    %51 = vector.load %arg2[%c4, %c0_63, %c0_64] : memref<9x4x8xf32, #tpu.memory_space<vmem>>, vector<1x4x8xf32>
    %52 = vector.shape_cast %51 : vector<1x4x8xf32> to vector<4x8xf32>
    %cst_65 = arith.constant dense<0.000000e+00> : vector<64x8xf32>
    %53 = tpu.matmul %50, %52, %cst_65 {dimension_numbers = #tpu.dot_dimension_numbers<[1], [0], [0], [1], [0, 0, 1, 1], [], []>} : vector<64x4xf32>, vector<4x8xf32>, vector<64x8xf32> -> vector<64x8xf32>
    %54 = arith.addf %48, %53 : vector<64x8xf32>
    %55 = vector.extract_strided_slice %42 {offsets = [2, 0, 0], sizes = [8, 8, 4], strides = [1, 1, 1]} : vector<10x8x4xf32> to vector<8x8x4xf32>
    %56 = vector.shape_cast %55 : vector<8x8x4xf32> to vector<64x4xf32>
    %c7_66 = arith.constant 7 : index
    %c0_67 = arith.constant 0 : index
    %c0_68 = arith.constant 0 : index
    %57 = vector.load %arg2[%c7_66, %c0_67, %c0_68] : memref<9x4x8xf32, #tpu.memory_space<vmem>>, vector<1x4x8xf32>
    %58 = vector.shape_cast %57 : vector<1x4x8xf32> to vector<4x8xf32>
    %cst_69 = arith.constant dense<0.000000e+00> : vector<64x8xf32>
    %59 = tpu.matmul %56, %58, %cst_69 {dimension_numbers = #tpu.dot_dimension_numbers<[1], [0], [0], [1], [0, 0, 1, 1], [], []>} : vector<64x4xf32>, vector<4x8xf32>, vector<64x8xf32> -> vector<64x8xf32>
    %60 = arith.addf %54, %59 : vector<64x8xf32>
    %c0_70 = arith.constant 0 : index
    %c9_71 = arith.constant 9 : index
    %c0_72 = arith.constant 0 : index
    %61 = vector.load %arg5[%c0_70, %c9_71, %c0_72] : memref<10x24x4xf32, #tpu.memory_space<vmem>>, vector<10x8x4xf32>
    %62 = vector.extract_strided_slice %61 {offsets = [0, 0, 0], sizes = [8, 8, 4], strides = [1, 1, 1]} : vector<10x8x4xf32> to vector<8x8x4xf32>
    %63 = vector.shape_cast %62 : vector<8x8x4xf32> to vector<64x4xf32>
    %c2_73 = arith.constant 2 : index
    %c0_74 = arith.constant 0 : index
    %c0_75 = arith.constant 0 : index
    %64 = vector.load %arg2[%c2_73, %c0_74, %c0_75] : memref<9x4x8xf32, #tpu.memory_space<vmem>>, vector<1x4x8xf32>
    %65 = vector.shape_cast %64 : vector<1x4x8xf32> to vector<4x8xf32>
    %cst_76 = arith.constant dense<0.000000e+00> : vector<64x8xf32>
    %66 = tpu.matmul %63, %65, %cst_76 {dimension_numbers = #tpu.dot_dimension_numbers<[1], [0], [0], [1], [0, 0, 1, 1], [], []>} : vector<64x4xf32>, vector<4x8xf32>, vector<64x8xf32> -> vector<64x8xf32>
    %67 = arith.addf %60, %66 : vector<64x8xf32>
    %68 = vector.extract_strided_slice %61 {offsets = [1, 0, 0], sizes = [8, 8, 4], strides = [1, 1, 1]} : vector<10x8x4xf32> to vector<8x8x4xf32>
    %69 = vector.shape_cast %68 : vector<8x8x4xf32> to vector<64x4xf32>
    %c5 = arith.constant 5 : index
    %c0_77 = arith.constant 0 : index
    %c0_78 = arith.constant 0 : index
    %70 = vector.load %arg2[%c5, %c0_77, %c0_78] : memref<9x4x8xf32, #tpu.memory_space<vmem>>, vector<1x4x8xf32>
    %71 = vector.shape_cast %70 : vector<1x4x8xf32> to vector<4x8xf32>
    %cst_79 = arith.constant dense<0.000000e+00> : vector<64x8xf32>
    %72 = tpu.matmul %69, %71, %cst_79 {dimension_numbers = #tpu.dot_dimension_numbers<[1], [0], [0], [1], [0, 0, 1, 1], [], []>} : vector<64x4xf32>, vector<4x8xf32>, vector<64x8xf32> -> vector<64x8xf32>
    %73 = arith.addf %67, %72 : vector<64x8xf32>
    %74 = vector.extract_strided_slice %61 {offsets = [2, 0, 0], sizes = [8, 8, 4], strides = [1, 1, 1]} : vector<10x8x4xf32> to vector<8x8x4xf32>
    %75 = vector.shape_cast %74 : vector<8x8x4xf32> to vector<64x4xf32>
    %c8_80 = arith.constant 8 : index
    %c0_81 = arith.constant 0 : index
    %c0_82 = arith.constant 0 : index
    %76 = vector.load %arg2[%c8_80, %c0_81, %c0_82] : memref<9x4x8xf32, #tpu.memory_space<vmem>>, vector<1x4x8xf32>
    %77 = vector.shape_cast %76 : vector<1x4x8xf32> to vector<4x8xf32>
    %cst_83 = arith.constant dense<0.000000e+00> : vector<64x8xf32>
    %78 = tpu.matmul %75, %77, %cst_83 {dimension_numbers = #tpu.dot_dimension_numbers<[1], [0], [0], [1], [0, 0, 1, 1], [], []>} : vector<64x4xf32>, vector<4x8xf32>, vector<64x8xf32> -> vector<64x8xf32>
    %79 = arith.addf %73, %78 : vector<64x8xf32>
    %cst_84 = arith.constant dense<0.000000e+00> : vector<8xf32>
    %80 = vector.multi_reduction <add>, %79, %cst_84 [0] : vector<64x8xf32> to vector<8xf32>
    %81 = vector.shape_cast %80 : vector<8xf32> to vector<1x8xf32>
    %cst_85 = arith.constant 1.562500e-02 : f32
    %82 = vector.broadcast %cst_85 : f32 to vector<1x8xf32>
    %83 = arith.mulf %81, %82 : vector<1x8xf32>
    %84 = vector.broadcast %83 : vector<1x8xf32> to vector<64x8xf32>
    %85 = arith.subf %79, %84 : vector<64x8xf32>
    %86 = arith.mulf %85, %85 : vector<64x8xf32>
    %cst_86 = arith.constant dense<0.000000e+00> : vector<8xf32>
    %87 = vector.multi_reduction <add>, %86, %cst_86 [0] : vector<64x8xf32> to vector<8xf32>
    %88 = vector.shape_cast %87 : vector<8xf32> to vector<1x8xf32>
    %cst_87 = arith.constant 1.562500e-02 : f32
    %89 = vector.broadcast %cst_87 : f32 to vector<1x8xf32>
    %90 = arith.mulf %88, %89 : vector<1x8xf32>
    %cst_88 = arith.constant 9.99999974E-6 : f32
    %91 = vector.broadcast %cst_88 : f32 to vector<1x8xf32>
    %92 = arith.addf %90, %91 : vector<1x8xf32>
    %93 = math.rsqrt %92 : vector<1x8xf32>
    %94 = vector.broadcast %93 : vector<1x8xf32> to vector<64x8xf32>
    %95 = arith.mulf %85, %94 : vector<64x8xf32>
    %cst_89 = arith.constant 0.000000e+00 : f32
    %96 = vector.broadcast %cst_89 : f32 to vector<64x8xf32>
    %97 = arith.cmpf oge, %95, %96 : vector<64x8xf32>
    %cst_90 = arith.constant 0.00999999977 : f32
    %98 = vector.broadcast %cst_90 : f32 to vector<64x8xf32>
    %99 = arith.mulf %98, %95 : vector<64x8xf32>
    %100 = arith.select %97, %95, %99 : vector<64x8xi1>, vector<64x8xf32>
    %101 = vector.shape_cast %100 : vector<64x8xf32> to vector<8x8x8xf32>
    %c1_91 = arith.constant 1 : index
    %c8_92 = arith.constant 8 : index
    %c0_93 = arith.constant 0 : index
    %102 = vector.load %arg6[%c1_91, %c8_92, %c0_93] : memref<10x24x8xf32, #tpu.memory_space<vmem>>, vector<8x8x8xf32>
    tpu.vector_store %arg6[%c1_91, %c8_92, %c0_93], %101 {strides = array<i32>} : memref<10x24x8xf32, #tpu.memory_space<vmem>>, vector<8x8x8xf32>,
    %c0_94 = arith.constant 0 : index
    %c7_95 = arith.constant 7 : index
    %c0_96 = arith.constant 0 : index
    %103 = vector.load %arg6[%c0_94, %c7_95, %c0_96] : memref<10x24x8xf32, #tpu.memory_space<vmem>>, vector<10x8x8xf32>
    %104 = vector.extract_strided_slice %103 {offsets = [0, 0, 0], sizes = [8, 8, 8], strides = [1, 1, 1]} : vector<10x8x8xf32> to vector<8x8x8xf32>
    %105 = vector.shape_cast %104 : vector<8x8x8xf32> to vector<64x8xf32>
    %c0_97 = arith.constant 0 : index
    %c0_98 = arith.constant 0 : index
    %c0_99 = arith.constant 0 : index
    %106 = vector.load %arg3[%c0_97, %c0_98, %c0_99] : memref<9x8x8xf32, #tpu.memory_space<vmem>>, vector<1x8x8xf32>
    %107 = vector.shape_cast %106 : vector<1x8x8xf32> to vector<8x8xf32>
    %cst_100 = arith.constant dense<0.000000e+00> : vector<64x8xf32>
    %108 = tpu.matmul %105, %107, %cst_100 {dimension_numbers = #tpu.dot_dimension_numbers<[1], [0], [0], [1], [0, 0, 1, 1], [], []>} : vector<64x8xf32>, vector<8x8xf32>, vector<64x8xf32> -> vector<64x8xf32>
    %109 = vector.extract_strided_slice %103 {offsets = [1, 0, 0], sizes = [8, 8, 8], strides = [1, 1, 1]} : vector<10x8x8xf32> to vector<8x8x8xf32>
    %110 = vector.shape_cast %109 : vector<8x8x8xf32> to vector<64x8xf32>
    %c3_101 = arith.constant 3 : index
    %c0_102 = arith.constant 0 : index
    %c0_103 = arith.constant 0 : index
    %111 = vector.load %arg3[%c3_101, %c0_102, %c0_103] : memref<9x8x8xf32, #tpu.memory_space<vmem>>, vector<1x8x8xf32>
    %112 = vector.shape_cast %111 : vector<1x8x8xf32> to vector<8x8xf32>
    %cst_104 = arith.constant dense<0.000000e+00> : vector<64x8xf32>
    %113 = tpu.matmul %110, %112, %cst_104 {dimension_numbers = #tpu.dot_dimension_numbers<[1], [0], [0], [1], [0, 0, 1, 1], [], []>} : vector<64x8xf32>, vector<8x8xf32>, vector<64x8xf32> -> vector<64x8xf32>
    %114 = arith.addf %108, %113 : vector<64x8xf32>
    %115 = vector.extract_strided_slice %103 {offsets = [2, 0, 0], sizes = [8, 8, 8], strides = [1, 1, 1]} : vector<10x8x8xf32> to vector<8x8x8xf32>
    %116 = vector.shape_cast %115 : vector<8x8x8xf32> to vector<64x8xf32>
    %c6_105 = arith.constant 6 : index
    %c0_106 = arith.constant 0 : index
    %c0_107 = arith.constant 0 : index
    %117 = vector.load %arg3[%c6_105, %c0_106, %c0_107] : memref<9x8x8xf32, #tpu.memory_space<vmem>>, vector<1x8x8xf32>
    %118 = vector.shape_cast %117 : vector<1x8x8xf32> to vector<8x8xf32>
    %cst_108 = arith.constant dense<0.000000e+00> : vector<64x8xf32>
    %119 = tpu.matmul %116, %118, %cst_108 {dimension_numbers = #tpu.dot_dimension_numbers<[1], [0], [0], [1], [0, 0, 1, 1], [], []>} : vector<64x8xf32>, vector<8x8xf32>, vector<64x8xf32> -> vector<64x8xf32>
    %120 = arith.addf %114, %119 : vector<64x8xf32>
    %c0_109 = arith.constant 0 : index
    %c8_110 = arith.constant 8 : index
    %c0_111 = arith.constant 0 : index
    %121 = vector.load %arg6[%c0_109, %c8_110, %c0_111] : memref<10x24x8xf32, #tpu.memory_space<vmem>>, vector<10x8x8xf32>
    %122 = vector.extract_strided_slice %121 {offsets = [0, 0, 0], sizes = [8, 8, 8], strides = [1, 1, 1]} : vector<10x8x8xf32> to vector<8x8x8xf32>
    %123 = vector.shape_cast %122 : vector<8x8x8xf32> to vector<64x8xf32>
    %c1_112 = arith.constant 1 : index
    %c0_113 = arith.constant 0 : index
    %c0_114 = arith.constant 0 : index
    %124 = vector.load %arg3[%c1_112, %c0_113, %c0_114] : memref<9x8x8xf32, #tpu.memory_space<vmem>>, vector<1x8x8xf32>
    %125 = vector.shape_cast %124 : vector<1x8x8xf32> to vector<8x8xf32>
    %cst_115 = arith.constant dense<0.000000e+00> : vector<64x8xf32>
    %126 = tpu.matmul %123, %125, %cst_115 {dimension_numbers = #tpu.dot_dimension_numbers<[1], [0], [0], [1], [0, 0, 1, 1], [], []>} : vector<64x8xf32>, vector<8x8xf32>, vector<64x8xf32> -> vector<64x8xf32>
    %127 = arith.addf %120, %126 : vector<64x8xf32>
    %128 = vector.extract_strided_slice %121 {offsets = [1, 0, 0], sizes = [8, 8, 8], strides = [1, 1, 1]} : vector<10x8x8xf32> to vector<8x8x8xf32>
    %129 = vector.shape_cast %128 : vector<8x8x8xf32> to vector<64x8xf32>
    %c4_116 = arith.constant 4 : index
    %c0_117 = arith.constant 0 : index
    %c0_118 = arith.constant 0 : index
    %130 = vector.load %arg3[%c4_116, %c0_117, %c0_118] : memref<9x8x8xf32, #tpu.memory_space<vmem>>, vector<1x8x8xf32>
    %131 = vector.shape_cast %130 : vector<1x8x8xf32> to vector<8x8xf32>
    %cst_119 = arith.constant dense<0.000000e+00> : vector<64x8xf32>
    %132 = tpu.matmul %129, %131, %cst_119 {dimension_numbers = #tpu.dot_dimension_numbers<[1], [0], [0], [1], [0, 0, 1, 1], [], []>} : vector<64x8xf32>, vector<8x8xf32>, vector<64x8xf32> -> vector<64x8xf32>
    %133 = arith.addf %127, %132 : vector<64x8xf32>
    %134 = vector.extract_strided_slice %121 {offsets = [2, 0, 0], sizes = [8, 8, 8], strides = [1, 1, 1]} : vector<10x8x8xf32> to vector<8x8x8xf32>
    %135 = vector.shape_cast %134 : vector<8x8x8xf32> to vector<64x8xf32>
    %c7_120 = arith.constant 7 : index
    %c0_121 = arith.constant 0 : index
    %c0_122 = arith.constant 0 : index
    %136 = vector.load %arg3[%c7_120, %c0_121, %c0_122] : memref<9x8x8xf32, #tpu.memory_space<vmem>>, vector<1x8x8xf32>
    %137 = vector.shape_cast %136 : vector<1x8x8xf32> to vector<8x8xf32>
    %cst_123 = arith.constant dense<0.000000e+00> : vector<64x8xf32>
    %138 = tpu.matmul %135, %137, %cst_123 {dimension_numbers = #tpu.dot_dimension_numbers<[1], [0], [0], [1], [0, 0, 1, 1], [], []>} : vector<64x8xf32>, vector<8x8xf32>, vector<64x8xf32> -> vector<64x8xf32>
    %139 = arith.addf %133, %138 : vector<64x8xf32>
    %c0_124 = arith.constant 0 : index
    %c9_125 = arith.constant 9 : index
    %c0_126 = arith.constant 0 : index
    %140 = vector.load %arg6[%c0_124, %c9_125, %c0_126] : memref<10x24x8xf32, #tpu.memory_space<vmem>>, vector<10x8x8xf32>
    %141 = vector.extract_strided_slice %140 {offsets = [0, 0, 0], sizes = [8, 8, 8], strides = [1, 1, 1]} : vector<10x8x8xf32> to vector<8x8x8xf32>
    %142 = vector.shape_cast %141 : vector<8x8x8xf32> to vector<64x8xf32>
    %c2_127 = arith.constant 2 : index
    %c0_128 = arith.constant 0 : index
    %c0_129 = arith.constant 0 : index
    %143 = vector.load %arg3[%c2_127, %c0_128, %c0_129] : memref<9x8x8xf32, #tpu.memory_space<vmem>>, vector<1x8x8xf32>
    %144 = vector.shape_cast %143 : vector<1x8x8xf32> to vector<8x8xf32>
    %cst_130 = arith.constant dense<0.000000e+00> : vector<64x8xf32>
    %145 = tpu.matmul %142, %144, %cst_130 {dimension_numbers = #tpu.dot_dimension_numbers<[1], [0], [0], [1], [0, 0, 1, 1], [], []>} : vector<64x8xf32>, vector<8x8xf32>, vector<64x8xf32> -> vector<64x8xf32>
    %146 = arith.addf %139, %145 : vector<64x8xf32>
    %147 = vector.extract_strided_slice %140 {offsets = [1, 0, 0], sizes = [8, 8, 8], strides = [1, 1, 1]} : vector<10x8x8xf32> to vector<8x8x8xf32>
    %148 = vector.shape_cast %147 : vector<8x8x8xf32> to vector<64x8xf32>
    %c5_131 = arith.constant 5 : index
    %c0_132 = arith.constant 0 : index
    %c0_133 = arith.constant 0 : index
    %149 = vector.load %arg3[%c5_131, %c0_132, %c0_133] : memref<9x8x8xf32, #tpu.memory_space<vmem>>, vector<1x8x8xf32>
    %150 = vector.shape_cast %149 : vector<1x8x8xf32> to vector<8x8xf32>
    %cst_134 = arith.constant dense<0.000000e+00> : vector<64x8xf32>
    %151 = tpu.matmul %148, %150, %cst_134 {dimension_numbers = #tpu.dot_dimension_numbers<[1], [0], [0], [1], [0, 0, 1, 1], [], []>} : vector<64x8xf32>, vector<8x8xf32>, vector<64x8xf32> -> vector<64x8xf32>
    %152 = arith.addf %146, %151 : vector<64x8xf32>
    %153 = vector.extract_strided_slice %140 {offsets = [2, 0, 0], sizes = [8, 8, 8], strides = [1, 1, 1]} : vector<10x8x8xf32> to vector<8x8x8xf32>
    %154 = vector.shape_cast %153 : vector<8x8x8xf32> to vector<64x8xf32>
    %c8_135 = arith.constant 8 : index
    %c0_136 = arith.constant 0 : index
    %c0_137 = arith.constant 0 : index
    %155 = vector.load %arg3[%c8_135, %c0_136, %c0_137] : memref<9x8x8xf32, #tpu.memory_space<vmem>>, vector<1x8x8xf32>
    %156 = vector.shape_cast %155 : vector<1x8x8xf32> to vector<8x8xf32>
    %cst_138 = arith.constant dense<0.000000e+00> : vector<64x8xf32>
    %157 = tpu.matmul %154, %156, %cst_138 {dimension_numbers = #tpu.dot_dimension_numbers<[1], [0], [0], [1], [0, 0, 1, 1], [], []>} : vector<64x8xf32>, vector<8x8xf32>, vector<64x8xf32> -> vector<64x8xf32>
    %158 = arith.addf %152, %157 : vector<64x8xf32>
    %cst_139 = arith.constant dense<0.000000e+00> : vector<8xf32>
    %159 = vector.multi_reduction <add>, %158, %cst_139 [0] : vector<64x8xf32> to vector<8xf32>
    %160 = vector.shape_cast %159 : vector<8xf32> to vector<1x8xf32>
    %cst_140 = arith.constant 1.562500e-02 : f32
    %161 = vector.broadcast %cst_140 : f32 to vector<1x8xf32>
    %162 = arith.mulf %160, %161 : vector<1x8xf32>
    %163 = vector.broadcast %162 : vector<1x8xf32> to vector<64x8xf32>
    %164 = arith.subf %158, %163 : vector<64x8xf32>
    %165 = arith.mulf %164, %164 : vector<64x8xf32>
    %cst_141 = arith.constant dense<0.000000e+00> : vector<8xf32>
    %166 = vector.multi_reduction <add>, %165, %cst_141 [0] : vector<64x8xf32> to vector<8xf32>
    %167 = vector.shape_cast %166 : vector<8xf32> to vector<1x8xf32>
    %cst_142 = arith.constant 1.562500e-02 : f32
    %168 = vector.broadcast %cst_142 : f32 to vector<1x8xf32>
    %169 = arith.mulf %167, %168 : vector<1x8xf32>
    %cst_143 = arith.constant 9.99999974E-6 : f32
    %170 = vector.broadcast %cst_143 : f32 to vector<1x8xf32>
    %171 = arith.addf %169, %170 : vector<1x8xf32>
    %172 = math.rsqrt %171 : vector<1x8xf32>
    %173 = vector.broadcast %172 : vector<1x8xf32> to vector<64x8xf32>
    %174 = arith.mulf %164, %173 : vector<64x8xf32>
    %cst_144 = arith.constant 0.000000e+00 : f32
    %175 = vector.broadcast %cst_144 : f32 to vector<64x8xf32>
    %176 = arith.cmpf oge, %174, %175 : vector<64x8xf32>
    %cst_145 = arith.constant 0.00999999977 : f32
    %177 = vector.broadcast %cst_145 : f32 to vector<64x8xf32>
    %178 = arith.mulf %177, %174 : vector<64x8xf32>
    %179 = arith.select %176, %174, %178 : vector<64x8xi1>, vector<64x8xf32>
    %c0_146 = arith.constant 0 : index
    %c0_147 = arith.constant 0 : index
    %c0_148 = arith.constant 0 : index
    %180 = vector.load %arg4[%c0_146, %c0_147, %c0_148] : memref<1x64x8xf32, #tpu.memory_space<vmem>>, vector<1x64x8xf32>
    %181 = vector.shape_cast %180 : vector<1x64x8xf32> to vector<64x8xf32>
    %182 = vector.shape_cast %179 : vector<64x8xf32> to vector<1x64x8xf32>
    tpu.vector_store %arg4[%c0_146, %c0_147, %c0_148], %182 {strides = array<i32>} : memref<1x64x8xf32, #tpu.memory_space<vmem>>, vector<1x64x8xf32>,
    return
  }
  func.func @transform_0(%arg0: i32) -> (i32, i32, i32, i32, i32) {
    %c0_i32 = arith.constant 0 : i32
    %c0_i32_0 = arith.constant 0 : i32
    %c0_i32_1 = arith.constant 0 : i32
    %c0_i32_2 = arith.constant 0 : i32
    %c0_i32_3 = arith.constant 0 : i32
    return %arg0, %c0_i32, %c0_i32_0, %c0_i32_1, %c0_i32_2 : i32, i32, i32, i32, i32
  }
  func.func @transform_1(%arg0: i32) -> (i32, i32, i32) {
    %c0_i32 = arith.constant 0 : i32
    %c0_i32_0 = arith.constant 0 : i32
    %c0_i32_1 = arith.constant 0 : i32
    %c0_i32_2 = arith.constant 0 : i32
    return %c0_i32, %c0_i32_0, %c0_i32_1 : i32, i32, i32
  }
  func.func @transform_2(%arg0: i32) -> (i32, i32, i32) {
    %c0_i32 = arith.constant 0 : i32
    %c0_i32_0 = arith.constant 0 : i32
    %c0_i32_1 = arith.constant 0 : i32
    %c0_i32_2 = arith.constant 0 : i32
    return %c0_i32, %c0_i32_0, %c0_i32_1 : i32, i32, i32
  }
  func.func @transform_3(%arg0: i32) -> (i32, i32, i32) {
    %c0_i32 = arith.constant 0 : i32
    %c0_i32_0 = arith.constant 0 : i32
    %c0_i32_1 = arith.constant 0 : i32
    return %arg0, %c0_i32, %c0_i32_0 : i32, i32, i32
  }
}

</mosaic_0001>

<bundles_post_ra>
// kernel: _downscale_forward.1
= control target key start
LH: loop header
LB: loop body
LE: loop exit
PB: predicated region body
PF: predicated region fallthrough
CT: control target
= control target key end

     0   :  { %s3523_s12 = smov 0   ;;  %s4112_s0 = inlined_call_operand.vmem [shape: f32[2,4,8,8,4], index: 0, kind: input, shape index: {}]   ;;  %s4113_s1 = inlined_call_operand.vmem [shape: f32[9,4,8], index: 1, kind: input, shape index: {}]   ;;  %s4114_s2 = inlined_call_operand.vmem [shape: f32[9,8,8], index: 2, kind: input, shape index: {}]   ;;  %s4115_s3 = inlined_call_operand.vmem [shape: f32[2,64,8], index: 3, kind: output, shape index: {}]  }
   0x1 LB: > { %s2861_s13 = sadd.s32 4294967295, %s3500_s12   ;;  %p2865_p0 = scmp.ge.s32.totalorder %s3500_s12, 1  ;;  %s3500_s12 = sphi %s3523_s12, %s13_s12  }
   0x2   : > { %p137_p1 = scmp.lt.s32.totalorder %s3500_s12, 3 }
   0x4   : > { %p138_p2 = pnand %p2865_p0, %p137_p1 }
   0x6   : > { %141 = sbr.rel (%p138_p2) target bundleno = 745 (0x2e9), region = 32 }
   0xb   : > { %v2894_v0 = vld [vmem:[%s4113_s1 + $0xc] sm:$0xf]  ;;  %vm334_vm0 = vcmask 1043456   ;;  %v307_v1 = vld [vmem:[%s4113_s1] sm:$0xf]  ;;  %p161_p3 = scmp.lt.s32.totalorder %s2861_s13, 1 }
   0xc   : > { %3229 = vmatprep.subr.msk.mxu0 %vm334_vm0, %v2894_v0  ;;  %3243 = vmatprep.subr.msk.mxu1 %vm334_vm0, %v307_v1  ;;  %vm230_vm1 = vcmask 31744   ;;  %vm238_vm2 = vcmask 24576   ;;  %v3542_v2 = vld [vmem:[%s4113_s1 + $0x18] sm:$0xf]  ;;  %v3502_v3 = vmov 0.0   ;;  %vm259_vm3 = vcmask 64512  }
   0xd   : > { %3230 = vmatpush3.msk.msra.mxu0 %vm334_vm0, %v2894_v0  ;;  %s4125_s13 = smov (!%p161_p3, %s2861_s13), 1  ;;  %240 = vst.msk [vmem:[#allocation2 + $0x1f] sm:$0x1] %vm238_vm2, %v3502_v3  ;;  %241 = vst.msk [vmem:[#allocation2 + $0x37] sm:$0x1] %vm238_vm2, %v3502_v3  ;;  %3244 = vmatpush3.msk.msra.mxu1 %vm334_vm0, %v307_v1  ;;  %vm267_vm4 = vcmask 57344  }
   0xe   : > { %231 = vst.msk [vmem:[#allocation2] sm:$0xff] %vm230_vm1, %v3502_v3  ;;  %232 = vst.msk [vmem:[#allocation2 + $0x8] sm:$0xff] %vm230_vm1, %v3502_v3  ;;  %v3595_v4 = vld [vmem:[%s4113_s1 + $0x4] sm:$0xf]  ;;  %3257 = vmatprep.subr.msk.mxu0 %vm334_vm0, %v3542_v2  ;;  %s3065_s22 = sshll.u32 %s4125_s13, 8  ;;  %s3066_s29 = sshll.u32 %s4125_s13, 6 }
   0xf   : > { %233 = vst.msk [vmem:[#allocation2 + $0x10] sm:$0xff] %vm230_vm1, %v3502_v3  ;;  %235 = vst.msk [vmem:[#allocation2 + $0xd8] sm:$0xff] %vm230_vm1, %v3502_v3  ;;  %3271 = vmatprep.subr.msk.mxu1 %vm334_vm0, %v3595_v4  ;;  %s3613_s25 = scalar_lea.vmem %s4112_s0, %s3065_s22  ;;  %v2933_v0 = vld [vmem:[%s4113_s1 + $0x10] sm:$0xf]  ;;  %s170_s5 = scalar_lea.vmem %s4115_s3, %s3066_s29 }
  0x10   : > { %236 = vst.msk [vmem:[#allocation2 + $0xe0] sm:$0xff] %vm230_vm1, %v3502_v3  ;;  %237 = vst.msk [vmem:[#allocation2 + $0xe8] sm:$0xff] %vm230_vm1, %v3502_v3  ;;  %v171_v5 = vld [vmem:[%s3613_s25] sm:$0xff]  ;;  %v172_v10 = vld [vmem:[%s3613_s25 + $0x8] sm:$0xff] }
  0x11   : > { %242 = vst.msk [vmem:[#allocation2 + $0x4f] sm:$0x1] %vm238_vm2, %v3502_v3  ;;  %243 = vst.msk [vmem:[#allocation2 + $0x67] sm:$0x1] %vm238_vm2, %v3502_v3  ;;  %v2870_v6 = vld [vmem:[%s3613_s25 + $0x40] sm:$0xff]  ;;  %v2871_v11 = vld [vmem:[%s3613_s25 + $0x48] sm:$0xff] }
  0x12   : > { %244 = vst.msk [vmem:[#allocation2 + $0x7f] sm:$0x1] %vm238_vm2, %v3502_v3  ;;  %245 = vst.msk [vmem:[#allocation2 + $0x97] sm:$0x1] %vm238_vm2, %v3502_v3  ;;  %v2878_v7 = vld [vmem:[%s3613_s25 + $0x80] sm:$0xff]  ;;  %v188_v8 = vmax.f32 %v171_v5, %v2870_v6  ;;  %v189_v13 = vmax.f32 %v172_v10, %v2871_v11  ;;  %v2879_v14 = vld [vmem:[%s3613_s25 + $0x88] sm:$0xff] }
  0x13   : > { %246 = vst.msk [vmem:[#allocation2 + $0xaf] sm:$0x1] %vm238_vm2, %v3502_v3  ;;  %247 = vst.msk [vmem:[#allocation2 + $0xc7] sm:$0x1] %vm238_vm2, %v3502_v3  ;;  %v2886_v9 = vld [vmem:[%s3613_s25 + $0xc0] sm:$0xff]  ;;  %v2887_v15 = vld [vmem:[%s3613_s25 + $0xc8] sm:$0xff] }
  0x14   : > { %250 = vst.msk [vmem:[#allocation2 + $0x28] sm:$0x1] %vm238_vm2, %v3502_v3  ;;  %251 = vst.msk [vmem:[#allocation2 + $0x40] sm:$0x1] %vm238_vm2, %v3502_v3  ;;  %v214_v12 = vmax.f32 %v2878_v7, %v2886_v9  ;;  %v173_v16 = vld [vmem:[%s3613_s25 + $0x10] sm:$0xff]  ;;  %v215_v17 = vmax.f32 %v2879_v14, %v2887_v15  ;;  %v174_v25 = vld [vmem:[%s3613_s25 + $0x18] sm:$0xff] }
  0x15   : > { %252 = vst.msk [vmem:[#allocation2 + $0x58] sm:$0x1] %vm238_vm2, %v3502_v3  ;;  %253 = vst.msk [vmem:[#allocation2 + $0x70] sm:$0x1] %vm238_vm2, %v3502_v3  ;;  %v2872_v18 = vld [vmem:[%s3613_s25 + $0x50] sm:$0xff]  ;;  %v2873_v26 = vld [vmem:[%s3613_s25 + $0x58] sm:$0xff] }
  0x16   : > { %254 = vst.msk [vmem:[#allocation2 + $0x88] sm:$0x1] %vm238_vm2, %v3502_v3  ;;  %255 = vst.msk [vmem:[#allocation2 + $0xa0] sm:$0x1] %vm238_vm2, %v3502_v3  ;;  %v2880_v19 = vld [vmem:[%s3613_s25 + $0x90] sm:$0xff]  ;;  %v222_v21 = vmax.f32 %v188_v8, %v214_v12  ;;  %v190_v23 = vmax.f32 %v173_v16, %v2872_v18  ;;  %v223_v27 = vmax.f32 %v189_v13, %v215_v17  ;;  %v2881_v29 = vld [vmem:[%s3613_s25 + $0x98] sm:$0xff] }
  0x17   : > { %256 = vst.msk [vmem:[#allocation2 + $0xb8] sm:$0x1] %vm238_vm2, %v3502_v3  ;;  %257 = vst.msk [vmem:[#allocation2 + $0xd0] sm:$0x1] %vm238_vm2, %v3502_v3  ;;  %v2888_v20 = vld [vmem:[%s3613_s25 + $0xd0] sm:$0xff]  ;;  %v191_v28 = vmax.f32 %v174_v25, %v2873_v26  ;;  %v2889_v30 = vld [vmem:[%s3613_s25 + $0xd8] sm:$0xff] }
  0x18   : > { %239 = vst.msk [vmem:[#allocation2 + $0x7] sm:$0x1] %vm238_vm2, %v3502_v3  ;;  %248 = vst.msk [vmem:[#allocation2 + $0xdf] sm:$0x1] %vm238_vm2, %v3502_v3  ;;  %v216_v24 = vmax.f32 %v2880_v19, %v2888_v20  ;;  %v175_v31 = vld [vmem:[%s3613_s25 + $0x20] sm:$0xff]  ;;  %v217_v33 = vmax.f32 %v2881_v29, %v2889_v30  ;;  %v176_v39 = vld [vmem:[%s3613_s25 + $0x28] sm:$0xff] }
  0x19   : > { %249 = vst.msk [vmem:[#allocation2 + $0x10] sm:$0x1] %vm238_vm2, %v3502_v3  ;;  %258 = vst.msk [vmem:[#allocation2 + $0xe8] sm:$0x1] %vm238_vm2, %v3502_v3  ;;  %v2874_v34 = vld [vmem:[%s3613_s25 + $0x60] sm:$0xff]  ;;  %v2875_v40 = vld [vmem:[%s3613_s25 + $0x68] sm:$0xff] }
  0x1a   : > { %289 = vst.msk [vmem:[#allocation2 + $0x20] sm:$0xff] %vm230_vm1, %v222_v21  ;;  %v224_v32 = vmax.f32 %v190_v23, %v216_v24  ;;  %v2882_v35 = vld [vmem:[%s3613_s25 + $0xa0] sm:$0xff]  ;;  %290 = vst.msk [vmem:[#allocation2 + $0x38] sm:$0xff] %vm230_vm1, %v223_v27  ;;  %v192_v37 = vmax.f32 %v175_v31, %v2874_v34  ;;  %v2883_v41 = vld [vmem:[%s3613_s25 + $0xa8] sm:$0xff]  ;;  %v225_v42 = vmax.f32 %v191_v28, %v217_v33 }
  0x1b   : > { %v2890_v36 = vld [vmem:[%s3613_s25 + $0xe0] sm:$0xff]  ;;  %v193_v43 = vmax.f32 %v176_v39, %v2875_v40  ;;  %v2891_v44 = vld [vmem:[%s3613_s25 + $0xe8] sm:$0xff]  ;;  %v177_v45 = vld [vmem:[%s3613_s25 + $0x30] sm:$0xff]  ;;  %260 = vst.msk [vmem:[#allocation3] sm:$0xff] %vm259_vm3, %v3502_v3 }
  0x1c   : > { %v218_v38 = vmax.f32 %v2882_v35, %v2890_v36  ;;  %291 = vst.msk [vmem:[#allocation2 + $0x50] sm:$0xff] %vm230_vm1, %v224_v32  ;;  %v2876_v46 = vld [vmem:[%s3613_s25 + $0x70] sm:$0xff]  ;;  %v219_v48 = vmax.f32 %v2883_v41, %v2891_v44  ;;  %v178_v52 = vld [vmem:[%s3613_s25 + $0x38] sm:$0xff]  ;;  %292 = vst.msk [vmem:[#allocation2 + $0x68] sm:$0xff] %vm230_vm1, %v225_v42 }
  0x1d   : > { %v194_v49 = vmax.f32 %v177_v45, %v2876_v46  ;;  %v2884_v50 = vld [vmem:[%s3613_s25 + $0xb0] sm:$0xff]  ;;  %v2877_v54 = vld [vmem:[%s3613_s25 + $0x78] sm:$0xff]  ;;  %v675_v9 = vld [vmem:[#allocation2 + $0x8] sm:$0xff]  ;;  %261 = vst.msk [vmem:[#allocation3 + $0x8] sm:$0xff] %vm259_vm3, %v3502_v3 }
  0x1e   : > { %v226_v47 = vmax.f32 %v192_v37, %v218_v38  ;;  %v2892_v51 = vld [vmem:[%s3613_s25 + $0xf0] sm:$0xff]  ;;  %v2885_v55 = vld [vmem:[%s3613_s25 + $0xb8] sm:$0xff]  ;;  %v227_v57 = vmax.f32 %v193_v43, %v219_v48  ;;  %v195_v58 = vmax.f32 %v178_v52, %v2877_v54  ;;  %v2953_v12 = vld [vmem:[%s4113_s1 + $0x8] sm:$0xf]  ;;  %262 = vst.msk [vmem:[#allocation3 + $0x10] sm:$0xff] %vm259_vm3, %v3502_v3 }
  0x1f   : > { %v297_v22 = vld [vmem:[#allocation2 + $0x7] sm:$0xff]  ;;  %v220_v53 = vmax.f32 %v2884_v50, %v2892_v51  ;;  %v2893_v56 = vld [vmem:[%s3613_s25 + $0xf8] sm:$0xff]  ;;  %v2963_v14 = vld [vmem:[%s4113_s1 + $0x14] sm:$0xf]  ;;  %264 = vst.msk [vmem:[#allocation3 + $0xd8] sm:$0xff] %vm259_vm3, %v3502_v3 }
  0x20   : > { %3245 = vmatprep.mubr.msk.f32.mxu1 %vm230_vm1, %v297_v22  ;;  %293 = vst.msk [vmem:[#allocation2 + $0x80] sm:$0xff] %vm230_vm1, %v226_v47  ;;  %v221_v59 = vmax.f32 %v2885_v55, %v2893_v56  ;;  %294 = vst.msk [vmem:[#allocation2 + $0x98] sm:$0xff] %vm230_vm1, %v227_v57  ;;  %v2943_v5 = vld [vmem:[%s4113_s1 + $0x1c] sm:$0xf]  ;;  %v2973_v20 = vld [vmem:[%s4113_s1 + $0x20] sm:$0xf] }
  0x21   : > { %v228_v60 = vmax.f32 %v194_v49, %v220_v53  ;;  %v298_v61 = vld [vmem:[#allocation2 + $0x1f] sm:$0xff]  ;;  %v299_v63 = vld [vmem:[#allocation2 + $0x37] sm:$0xff]  ;;  %v1069_v24 = vld [vmem:[#allocation2 + $0x9] sm:$0xff]  ;;  %265 = vst.msk [vmem:[#allocation3 + $0xe0] sm:$0xff] %vm259_vm3, %v3502_v3 }
  0x22   : > { %v229_v62 = vmax.f32 %v195_v58, %v221_v59  ;;  %3231 = vmatprep.mubr.msk.f32.mxu0 %vm230_vm1, %v298_v61  ;;  %3246 = vmatmul.mubr.msk.f32.vlgmr.msra.gmra.mxu1 %vm230_vm1, %v298_v61  ;;  %v676_v10 = vld [vmem:[#allocation2 + $0x20] sm:$0xff]  ;;  %v677_v11 = vld [vmem:[#allocation2 + $0x38] sm:$0xff]  ;;  %266 = vst.msk [vmem:[#allocation3 + $0xe8] sm:$0xff] %vm259_vm3, %v3502_v3 }
  0x23   : > { %295 = vst.msk [vmem:[#allocation2 + $0xb0] sm:$0xff] %vm230_vm1, %v228_v60  ;;  %3232 = vmatmul.mubr.msk.f32.vlgmr.msra.gmra.mxu0 %vm230_vm1, %v299_v63  ;;  %v300_v1 = vld [vmem:[#allocation2 + $0x4f] sm:$0xff]  ;;  %3248 = vmatprep.mubr.msk.f32.mxu1 %vm230_vm1, %v299_v63  ;;  %v301_v6 = vld [vmem:[#allocation2 + $0x67] sm:$0xff]  ;;  %v306_v19 = vld [vmem:[#allocation2 + $0xdf] sm:$0xff] }
  0x24   : > { %296 = vst.msk [vmem:[#allocation2 + $0xc8] sm:$0xff] %vm230_vm1, %v229_v62  ;;  %3258 = vmatpush3.msk.msra.mxu0 %vm334_vm0, %v3542_v2  ;;  %3234 = vmatprep.mubr.msk.f32.mxu0 %vm230_vm1, %v300_v1  ;;  %v678_v13 = vld [vmem:[#allocation2 + $0x50] sm:$0xff]  ;;  %v679_v15 = vld [vmem:[#allocation2 + $0x68] sm:$0xff]  ;;  %v684_v22 = vld [vmem:[#allocation2 + $0xe0] sm:$0xff] }
  0x25   : > { %3272 = vmatpush3.msk.msra.mxu1 %vm334_vm0, %v3595_v4  ;;  %3285 = vmatprep.subr.msk.mxu0 %vm334_vm0, %v2933_v0  ;;  %v1070_v23 = vld [vmem:[#allocation2 + $0x21] sm:$0xff]  ;;  %v1071_v25 = vld [vmem:[#allocation2 + $0x39] sm:$0xff]  ;;  %v1072_v26 = vld [vmem:[#allocation2 + $0x51] sm:$0xff]  ;;  %268 = vst.msk [vmem:[#allocation3 + $0x7] sm:$0x1] %vm267_vm4, %v3502_v3 }
  0x26   : > { %3249 = vmatmul.mubr.msk.f32.gmra.mxu1 %vm230_vm1, %v300_v1  ;;  %3299 = vmatprep.subr.msk.mxu1 %vm334_vm0, %v2943_v5  ;;  %v1073_v27 = vld [vmem:[#allocation2 + $0x69] sm:$0xff]  ;;  %v1078_v32 = vld [vmem:[#allocation2 + $0xe1] sm:$0xff]  ;;  %269 = vst.msk [vmem:[#allocation3 + $0x1f] sm:$0x1] %vm267_vm4, %v3502_v3  ;;  %270 = vst.msk [vmem:[#allocation3 + $0x37] sm:$0x1] %vm267_vm4, %v3502_v3 }
  0x27   : > { %v302_v7 = vld [vmem:[#allocation2 + $0x7f] sm:$0xff]  ;;  %3235 = vmatmul.mubr.msk.f32.gmra.mxu0 %vm230_vm1, %v301_v6  ;;  %3251 = vmatprep.mubr.msk.f32.mxu1 %vm230_vm1, %v301_v6  ;;  %v303_v2 = vld [vmem:[#allocation2 + $0x97] sm:$0xff]  ;;  %271 = vst.msk [vmem:[#allocation3 + $0x4f] sm:$0x1] %vm267_vm4, %v3502_v3  ;;  %272 = vst.msk [vmem:[#allocation3 + $0x67] sm:$0x1] %vm267_vm4, %v3502_v3 }
  0x28   : > { %3237 = vmatprep.mubr.msk.f32.mxu0 %vm230_vm1, %v302_v7  ;;  %v680_v16 = vld [vmem:[#allocation2 + $0x80] sm:$0xff]  ;;  %v681_v17 = vld [vmem:[#allocation2 + $0x98] sm:$0xff]  ;;  %273 = vst.msk [vmem:[#allocation3 + $0x7f] sm:$0x1] %vm267_vm4, %v3502_v3  ;;  %274 = vst.msk [vmem:[#allocation3 + $0x97] sm:$0x1] %vm267_vm4, %v3502_v3 }
  0x29   : > { %v1074_v28 = vld [vmem:[#allocation2 + $0x81] sm:$0xff]  ;;  %v1075_v29 = vld [vmem:[#allocation2 + $0x99] sm:$0xff]  ;;  %275 = vst.msk [vmem:[#allocation3 + $0xaf] sm:$0x1] %vm267_vm4, %v3502_v3  ;;  %276 = vst.msk [vmem:[#allocation3 + $0xc7] sm:$0x1] %vm267_vm4, %v3502_v3 }
  0x2a   : > { %v304_v8 = vld [vmem:[#allocation2 + $0xaf] sm:$0xff]  ;;  %3252 = vmatmul.mubr.msk.f32.gmra.mxu1 %vm230_vm1, %v302_v7  ;;  %277 = vst.msk [vmem:[#allocation3 + $0xdf] sm:$0x1] %vm267_vm4, %v3502_v3  ;;  %278 = vst.msk [vmem:[#allocation3 + $0x10] sm:$0x1] %vm267_vm4, %v3502_v3 }
  0x2b   : > { %3238 = vmatmul.mubr.msk.f32.gmra.mxu0 %vm230_vm1, %v303_v2  ;;  %3254 = vmatprep.mubr.msk.f32.mxu1 %vm230_vm1, %v303_v2  ;;  %v305_v4 = vld [vmem:[#allocation2 + $0xc7] sm:$0xff]  ;;  %v682_v18 = vld [vmem:[#allocation2 + $0xb0] sm:$0xff]  ;;  %279 = vst.msk [vmem:[#allocation3 + $0x28] sm:$0x1] %vm267_vm4, %v3502_v3  ;;  %280 = vst.msk [vmem:[#allocation3 + $0x40] sm:$0x1] %vm267_vm4, %v3502_v3 }
  0x2c   : > { %3240 = vmatprep.mubr.msk.f32.mxu0 %vm230_vm1, %v304_v8  ;;  %v683_v21 = vld [vmem:[#allocation2 + $0xc8] sm:$0xff]  ;;  %v1076_v30 = vld [vmem:[#allocation2 + $0xb1] sm:$0xff]  ;;  %281 = vst.msk [vmem:[#allocation3 + $0x58] sm:$0x1] %vm267_vm4, %v3502_v3  ;;  %282 = vst.msk [vmem:[#allocation3 + $0x70] sm:$0x1] %vm267_vm4, %v3502_v3 }
  0x2d   : > { %v1077_v31 = vld [vmem:[#allocation2 + $0xc9] sm:$0xff]  ;;  %283 = vst.msk [vmem:[#allocation3 + $0x88] sm:$0x1] %vm267_vm4, %v3502_v3  ;;  %284 = vst.msk [vmem:[#allocation3 + $0xa0] sm:$0x1] %vm267_vm4, %v3502_v3 }
  0x2e   : > { %3255 = vmatmul.mubr.msk.f32.gmra.mxu1 %vm230_vm1, %v304_v8  ;;  %285 = vst.msk [vmem:[#allocation3 + $0xb8] sm:$0x1] %vm267_vm4, %v3502_v3  ;;  %286 = vst.msk [vmem:[#allocation3 + $0xd0] sm:$0x1] %vm267_vm4, %v3502_v3 }
  0x2f   : > { %3241 = vmatmul.mubr.msk.f32.gmra.mxu0 %vm230_vm1, %v305_v4  ;;  %3273 = vmatprep.mubr.msk.f32.mxu1 %vm230_vm1, %v675_v9  ;;  %287 = vst.msk [vmem:[#allocation3 + $0xe8] sm:$0x1] %vm267_vm4, %v3502_v3  ;;  %v1566_v9 = vld [vmem:[#allocation3 + $0x7] sm:$0xff] }
  0x30   : > { %3259 = vmatprep.mubr.msk.f32.mxu0 %vm230_vm1, %v299_v63 }
  0x32   : > { %3274 = vmatmul.mubr.msk.f32.vlgmr.msra.gmra.mxu1 %vm230_vm1, %v676_v10 }
  0x33   : > { %3260 = vmatmul.mubr.msk.f32.vlgmr.msra.gmra.mxu0 %vm230_vm1, %v300_v1  ;;  %3276 = vmatprep.mubr.msk.f32.mxu1 %vm230_vm1, %v677_v11  ;;  %v2983_v1 = vld [vmem:[%s4114_s2 + $0x18] sm:$0xff] }
  0x34   : > { %3286 = vmatpush3.msk.msra.mxu0 %vm334_vm0, %v2933_v0  ;;  %3262 = vmatprep.mubr.msk.f32.mxu0 %vm230_vm1, %v301_v6 }
  0x35   : > { %3300 = vmatpush3.msk.msra.mxu1 %vm334_vm0, %v2943_v5  ;;  %3313 = vmatprep.subr.msk.mxu0 %vm334_vm0, %v2953_v12  ;;  %v1576_v5 = vld [vmem:[%s4114_s2] sm:$0xff] }
  0x36   : > { %3277 = vmatmul.mubr.msk.f32.gmra.mxu1 %vm230_vm1, %v678_v13  ;;  %3327 = vmatprep.subr.msk.mxu1 %vm334_vm0, %v2963_v14 }
  0x37   : > { %3263 = vmatmul.mubr.msk.f32.gmra.mxu0 %vm230_vm1, %v302_v7  ;;  %3279 = vmatprep.mubr.msk.f32.mxu1 %vm230_vm1, %v679_v15 }
  0x38   : > { %3265 = vmatprep.mubr.msk.f32.mxu0 %vm230_vm1, %v303_v2 }
  0x3a   : > { %3280 = vmatmul.mubr.msk.f32.gmra.mxu1 %vm230_vm1, %v680_v16 }
  0x3b   : > { %3266 = vmatmul.mubr.msk.f32.gmra.mxu0 %vm230_vm1, %v304_v8  ;;  %3282 = vmatprep.mubr.msk.f32.mxu1 %vm230_vm1, %v681_v17 }
  0x3c   : > { %3268 = vmatprep.mubr.msk.f32.mxu0 %vm230_vm1, %v305_v4 }
  0x3e   : > { %3283 = vmatmul.mubr.msk.f32.gmra.mxu1 %vm230_vm1, %v682_v18 }
  0x3f   : > { %3269 = vmatmul.mubr.msk.f32.gmra.mxu0 %vm230_vm1, %v306_v19  ;;  %3301 = vmatprep.mubr.msk.f32.mxu1 %vm230_vm1, %v677_v11 }
  0x40   : > { %3287 = vmatprep.mubr.msk.f32.mxu0 %vm230_vm1, %v676_v10  ;;  %v3881_v10 = vld [vmem:[%s4114_s2 + $0x30] sm:$0xff] }
  0x42   : > { %3302 = vmatmul.mubr.msk.f32.vlgmr.msra.gmra.mxu1 %vm230_vm1, %v678_v13 }
  0x43   : > { %3288 = vmatmul.mubr.msk.f32.vlgmr.msra.gmra.mxu0 %vm230_vm1, %v677_v11  ;;  %3304 = vmatprep.mubr.msk.f32.mxu1 %vm230_vm1, %v679_v15 }
  0x44   : > { %3314 = vmatpush3.msk.msra.mxu0 %vm334_vm0, %v2953_v12  ;;  %3290 = vmatprep.mubr.msk.f32.mxu0 %vm230_vm1, %v678_v13 }
  0x45   : > { %3328 = vmatpush3.msk.msra.mxu1 %vm334_vm0, %v2963_v14  ;;  %3341 = vmatprep.subr.msk.mxu0 %vm334_vm0, %v2973_v20 }
  0x46   : > { %3305 = vmatmul.mubr.msk.f32.gmra.mxu1 %vm230_vm1, %v680_v16  ;;  %3355 = vmatprep.subr.mxu1 %v2983_v1 }
  0x47   : > { %3291 = vmatmul.mubr.msk.f32.gmra.mxu0 %vm230_vm1, %v679_v15  ;;  %3307 = vmatprep.mubr.msk.f32.mxu1 %vm230_vm1, %v681_v17 }
  0x48   : > { %3293 = vmatprep.mubr.msk.f32.mxu0 %vm230_vm1, %v680_v16 }
  0x4a   : > { %3308 = vmatmul.mubr.msk.f32.gmra.mxu1 %vm230_vm1, %v682_v18 }
  0x4b   : > { %3294 = vmatmul.mubr.msk.f32.gmra.mxu0 %vm230_vm1, %v681_v17  ;;  %3310 = vmatprep.mubr.msk.f32.mxu1 %vm230_vm1, %v683_v21 }
  0x4c   : > { %3296 = vmatprep.mubr.msk.f32.mxu0 %vm230_vm1, %v682_v18 }
  0x4e   : > { %3311 = vmatmul.mubr.msk.f32.gmra.mxu1 %vm230_vm1, %v684_v22 }
  0x4f   : > { %3297 = vmatmul.mubr.msk.f32.gmra.mxu0 %vm230_vm1, %v683_v21  ;;  %3329 = vmatprep.mubr.msk.f32.mxu1 %vm230_vm1, %v1070_v23 }
  0x50   : > { %3315 = vmatprep.mubr.msk.f32.mxu0 %vm230_vm1, %v1069_v24 }
  0x52   : > { %3330 = vmatmul.mubr.msk.f32.vlgmr.msra.gmra.mxu1 %vm230_vm1, %v1071_v25 }
  0x53   : > { %3316 = vmatmul.mubr.msk.f32.vlgmr.msra.gmra.mxu0 %vm230_vm1, %v1070_v23  ;;  %3332 = vmatprep.mubr.msk.f32.mxu1 %vm230_vm1, %v1072_v26 }
  0x54   : > { %3342 = vmatpush3.msk.msra.mxu0 %vm334_vm0, %v2973_v20  ;;  %3318 = vmatprep.mubr.msk.f32.mxu0 %vm230_vm1, %v1071_v25 }
  0x55   : > { %3369 = vmatprep.subr.mxu0 %v1576_v5  ;;  %3356 = vmatpush3.msra.mxu1 %v2983_v1 }
  0x56   : > { %3333 = vmatmul.mubr.msk.f32.gmra.mxu1 %vm230_vm1, %v1073_v27  ;;  %3383 = vmatprep.subr.mxu1 %v3881_v10 }
  0x57   : > { %3319 = vmatmul.mubr.msk.f32.gmra.mxu0 %vm230_vm1, %v1072_v26  ;;  %3335 = vmatprep.mubr.msk.f32.mxu1 %vm230_vm1, %v1074_v28 }
  0x58   : > { %3321 = vmatprep.mubr.msk.f32.mxu0 %vm230_vm1, %v1073_v27 }
  0x5a   : > { %3336 = vmatmul.mubr.msk.f32.gmra.mxu1 %vm230_vm1, %v1075_v29 }
  0x5b   : > { %3322 = vmatmul.mubr.msk.f32.gmra.mxu0 %vm230_vm1, %v1074_v28  ;;  %3338 = vmatprep.mubr.msk.f32.mxu1 %vm230_vm1, %v1076_v30 }
  0x5c   : > { %3324 = vmatprep.mubr.msk.f32.mxu0 %vm230_vm1, %v1075_v29 }
  0x5e   : > { %3339 = vmatmul.mubr.msk.f32.gmra.mxu1 %vm230_vm1, %v1077_v31 }
  0x5f   : > { %3325 = vmatmul.mubr.msk.f32.gmra.mxu0 %vm230_vm1, %v1076_v30 }
  0x60   : > { %3343 = vmatprep.mubr.msk.f32.mxu0 %vm230_vm1, %v1071_v25 }
  0x63   : > { %3344 = vmatmul.mubr.msk.f32.vlgmr.msra.gmra.mxu0 %vm230_vm1, %v1072_v26 }
  0x64   : > { %3346 = vmatprep.mubr.msk.f32.mxu0 %vm230_vm1, %v1073_v27  ;;  %3370 = vmatpush3.msra.mxu0 %v1576_v5 }
  0x67   : > { %3347 = vmatmul.mubr.msk.f32.gmra.mxu0 %vm230_vm1, %v1074_v28 }
  0x68   : > { %3349 = vmatprep.mubr.msk.f32.mxu0 %vm230_vm1, %v1075_v29  ;;  %v3902_v29 = vld [vmem:[%s4114_s2 + $0x8] sm:$0xff] }
  0x69   : > { %3397 = vmatprep.subr.mxu0 %v3902_v29 }
  0x6b   : > { %3350 = vmatmul.mubr.msk.f32.gmra.mxu0 %vm230_vm1, %v1076_v30 }
  0x6c   : > { %3352 = vmatprep.mubr.msk.f32.mxu0 %vm230_vm1, %v1077_v31 }
  0x6f   : > { %3353 = vmatmul.mubr.msk.f32.gmra.mxu0 %vm230_vm1, %v1078_v32 }
  0x70   : > { %3371 = vmatprep.mubr.msk.f32.mxu0 %vm259_vm3, %v1566_v9 }
  0xe2   : > { %v3768_v33 = vpop.f32.mrf.mxu1 }
  0xe3   : > { %v3770_v34 = vpop.f32.mrf.mxu0 }
  0xe4   : > { %v3772_v35 = vpop.f32.mrf.mxu1  ;;  %v521_v21 = vadd.f32 %v3768_v33, %v3770_v34 }
  0xe5   : > { %v3774_v36 = vpop.f32.mrf.mxu0 }
  0xe6   : > { %v3776_v37 = vpop.f32.mrf.mxu1  ;;  %v516_v22 = vadd.f32 %v3772_v35, %v3774_v36 }
  0xe7   : > { %v3778_v38 = vpop.f32.mrf.mxu0 }
  0xe8   : > { %v3780_v39 = vpop.f32.mrf.mxu1  ;;  %v531_v30 = vadd.f32 %v3776_v37, %v3778_v38 }
  0xe9   : > { %v3782_v40 = vpop.f32.mrf.mxu0 }
  0xea   : > { %v3784_v41 = vpop.f32.mrf.mxu1  ;;  %v526_v31 = vadd.f32 %v3780_v39, %v3782_v40 }
  0xeb   : > { %v3786_v42 = vpop.f32.mrf.mxu0 }
  0xec   : > { %v3788_v43 = vpop.f32.mrf.mxu1 }
  0xed   : > { %v3790_v44 = vpop.f32.mrf.mxu0 }
  0xee   : > { %v3792_v45 = vpop.f32.mrf.mxu1  ;;  %v536_v37 = vadd.f32 %v3788_v43, %v3790_v44 }
  0xef   : > { %v3794_v46 = vpop.f32.mrf.mxu0 }
  0xf0   : > { %v3796_v47 = vpop.f32.mrf.mxu1 }
  0xf1   : > { %v3798_v48 = vpop.f32.mrf.mxu0 }
  0xf2   : > { %v3800_v49 = vpop.f32.mrf.mxu1 }
  0xf3   : > { %v3802_v50 = vpop.f32.mrf.mxu0 }
  0xf4   : > { %v3804_v51 = vpop.f32.mrf.mxu1  ;;  %v668_v25 = vadd.f32 %v3802_v50, %v521_v21  ;;  %v541_v50 = vadd.f32 %v3784_v41, %v3786_v42  ;;  %v546_v41 = vadd.f32 %v3796_v47, %v3798_v48 }
  0xf5   : > { %v3806_v52 = vpop.f32.mrf.mxu0 }
  0xf6   : > { %v3808_v53 = vpop.f32.mrf.mxu1  ;;  %v667_v26 = vadd.f32 %v3806_v52, %v516_v22  ;;  %v820_v33 = vadd.f32 %v3800_v49, %v668_v25 }
  0xf7   : > { %v3810_v54 = vpop.f32.mrf.mxu0 }
  0xf8   : > { %v3812_v55 = vpop.f32.mrf.mxu1  ;;  %v670_v34 = vadd.f32 %v3810_v54, %v531_v30  ;;  %v819_v35 = vadd.f32 %v3804_v51, %v667_v26 }
  0xf9   : > { %v3814_v56 = vpop.f32.mrf.mxu0 }
  0xfa   : > { %v3816_v57 = vpop.f32.mrf.mxu1  ;;  %v669_v36 = vadd.f32 %v3814_v56, %v526_v31  ;;  %v822_v49 = vadd.f32 %v3808_v53, %v670_v34  ;;  %v551_v56 = vadd.f32 %v3792_v45, %v3794_v46 }
  0xfb   : > { %v3818_v58 = vpop.f32.mrf.mxu0 }
  0xfc   : > { %v3820_v59 = vpop.f32.mrf.mxu1  ;;  %v672_v40 = vadd.f32 %v3818_v58, %v541_v50  ;;  %v821_v54 = vadd.f32 %v3812_v55, %v669_v36 }
  0xfd   : > { %v3822_v60 = vpop.f32.mrf.mxu0 }
  0xfe   : > { %v3824_v61 = vpop.f32.mrf.mxu1  ;;  %v671_v51 = vadd.f32 %v3822_v60, %v536_v37  ;;  %v824_v58 = vadd.f32 %v3816_v57, %v672_v40 }
  0xff   : > { %v3826_v62 = vpop.f32.mrf.mxu0 }
 0x100   : > { %v3828_v63 = vpop.f32.mrf.mxu1  ;;  %v674_v53 = vadd.f32 %v3826_v62, %v551_v56  ;;  %v823_v60 = vadd.f32 %v3820_v59, %v671_v51 }
 0x101   : > { %v3870_v0 = vpop.f32.mrf.mxu0 }
 0x102   : > { %v3303_v6 = vpop.f32.mrf.mxu1  ;;  %v673_v55 = vadd.f32 %v3870_v0, %v546_v41 }
 0x103   : > { %v3289_v7 = vpop.f32.mrf.mxu0 }
 0x104   : > { %v1022_v2 = vpop.f32.mrf.mxu1  ;;  %v941_v38 = vadd.f32 %v3289_v7, %v820_v33 }
 0x105   : > { %v901_v8 = vpop.f32.mrf.mxu0 }
 0x106   : > { %v3306_v4 = vpop.f32.mrf.mxu1  ;;  %v940_v39 = vadd.f32 %v901_v8, %v819_v35  ;;  %v1062_v43 = vadd.f32 %v3303_v6, %v941_v38 }
 0x107   : > { %v3292_v3 = vpop.f32.mrf.mxu0 }
 0x108   : > { %v1032_v11 = vpop.f32.mrf.mxu1  ;;  %v943_v44 = vadd.f32 %v3292_v3, %v822_v49  ;;  %v1061_v7 = vadd.f32 %v1022_v2, %v940_v39  ;;  %v826_v2 = vadd.f32 %v3824_v61, %v674_v53  ;;  %v825_v3 = vadd.f32 %v3828_v63, %v673_v55 }
 0x109   : > { %v911_v12 = vpop.f32.mrf.mxu0 }
 0x10a   : > { %v3885_v13 = vpop.f32.mrf.mxu1  ;;  %v942_v8 = vadd.f32 %v911_v12, %v821_v54  ;;  %v1064_v48 = vadd.f32 %v3306_v4, %v943_v44 }
 0x10b   : > { %v3295_v14 = vpop.f32.mrf.mxu0 }
 0x10c   : > { %v3887_v15 = vpop.f32.mrf.mxu1  ;;  %v945_v46 = vadd.f32 %v3295_v14, %v824_v58  ;;  %v1063_v26 = vadd.f32 %v1032_v11, %v942_v8 }
 0x10d   : > { %v921_v16 = vpop.f32.mrf.mxu0 }
 0x10e   : > { %v3889_v17 = vpop.f32.mrf.mxu1  ;;  %v944_v6 = vadd.f32 %v921_v16, %v823_v60  ;;  %v1066_v31 = vadd.f32 %v3885_v13, %v945_v46 }
 0x10f   : > { %v3298_v18 = vpop.f32.mrf.mxu0 }
 0x110   : > { %v3891_v19 = vpop.f32.mrf.mxu1  ;;  %v947_v59 = vadd.f32 %v3298_v18, %v826_v2  ;;  %v1065_v14 = vadd.f32 %v3887_v15, %v944_v6 }
 0x111   : > { %v931_v20 = vpop.f32.mrf.mxu0 }
 0x112   : > { %v3331_v23 = vpop.f32.mrf.mxu1  ;;  %v946_v33 = vadd.f32 %v931_v20, %v825_v3 }
 0x113   : > { %v3317_v24 = vpop.f32.mrf.mxu0 }
 0x114   : > { %v1295_v28 = vpop.f32.mrf.mxu1  ;;  %v1214_v22 = vadd.f32 %v3317_v24, %v1062_v43  ;;  %v1067_v13 = vadd.f32 %v3891_v19, %v946_v33 }
 0x115   : > { %v1174_v27 = vpop.f32.mrf.mxu0 }
 0x116   : > { %v3334_v1 = vpop.f32.mrf.mxu1  ;;  %v1213_v45 = vadd.f32 %v1174_v27, %v1061_v7  ;;  %v1335_v12 = vadd.f32 %v3331_v23, %v1214_v22 }
 0x117   : > { %v3320_v32 = vpop.f32.mrf.mxu0 }
 0x118   : > { %v1305_v42 = vpop.f32.mrf.mxu1  ;;  %v1216_v62 = vadd.f32 %v3320_v32, %v1064_v48  ;;  %v1334_v30 = vadd.f32 %v1295_v28, %v1213_v45  ;;  %v1068_v28 = vadd.f32 %v3889_v17, %v947_v59 }
 0x119   : > { %v1184_v52 = vpop.f32.mrf.mxu0 }
 0x11a   : > { %v3337_v25 = vpop.f32.mrf.mxu1  ;;  %v1215_v0 = vadd.f32 %v1184_v52, %v1063_v26  ;;  %v1337_v61 = vadd.f32 %v3334_v1, %v1216_v62 }
 0x11b   : > { %v3323_v5 = vpop.f32.mrf.mxu0 }
 0x11c   : > { %v1315_v24 = vpop.f32.mrf.mxu1  ;;  %v1218_v16 = vadd.f32 %v3323_v5, %v1066_v31  ;;  %v1336_v35 = vadd.f32 %v1305_v42, %v1215_v0 }
 0x11d   : > { %v1194_v9 = vpop.f32.mrf.mxu0 }
 0x11e   : > { %v1217_v63 = vadd.f32 %v1194_v9, %v1065_v14  ;;  %v3340_v32 = vpop.f32.mrf.mxu1  ;;  %v1339_v20 = vadd.f32 %v3337_v25, %v1218_v16 }
 0x11f   : > { %v3326_v21 = vpop.f32.mrf.mxu0 }
 0x120   : > { %v1220_v38 = vadd.f32 %v3326_v21, %v1068_v28  ;;  %v1338_v39 = vadd.f32 %v1315_v24, %v1217_v63  ;;  %v1325_v5 = vpop.f32.mrf.mxu1 }
 0x121   : > { %v1204_v47 = vpop.f32.mrf.mxu0 }
 0x122   : > { %v1219_v1 = vadd.f32 %v1204_v47, %v1067_v13  ;;  %v1341_v42 = vadd.f32 %v3340_v32, %v1220_v38 }
 0x123   : > { %v3345_v57 = vpop.f32.mrf.mxu0 }
 0x124   : > { %v1456_v4 = vadd.f32 %v3345_v57, %v1335_v12  ;;  %v1340_v9 = vadd.f32 %v1325_v5, %v1219_v1 }
 0x125   : > { %v1416_v27 = vpop.f32.mrf.mxu0 }
 0x126   : > { %v1455_v11 = vadd.f32 %v1416_v27, %v1334_v30  ;;  %v1464_v18 = vsel %vm259_vm3, %v1456_v4, 0.0 }
 0x127   : > { %v3348_v34 = vpop.f32.mrf.mxu0 }
 0x128   : > { %v1463_v23 = vsel %vm259_vm3, %v1455_v11, 0.0  ;;  %v1458_v50 = vadd.f32 %v3348_v34, %v1337_v61 }
 0x129   : > { %v1426_v36 = vpop.f32.mrf.mxu0  ;;  %v1465_v52 = vadd.f32 %v1464_v18, %v1463_v23 }
 0x12a   : > { %v1457_v15 = vadd.f32 %v1426_v36, %v1336_v35  ;;  %v1468_v17 = vsel %vm259_vm3, %v1458_v50, 0.0 }
 0x12b   : > { %v3351_v37 = vpop.f32.mrf.mxu0 }
 0x12c   : > { %v1466_v40 = vsel %vm259_vm3, %v1457_v15, 0.0  ;;  %v1460_v51 = vadd.f32 %v3351_v37, %v1339_v20 }
 0x12d   : > { %v1467_v49 = vadd.f32 %v1466_v40, %v1465_v52  ;;  %v1436_v54 = vpop.f32.mrf.mxu0 }
 0x12e   : > { %v1459_v56 = vadd.f32 %v1436_v54, %v1338_v39  ;;  %v1472_v8 = vsel %vm259_vm3, %v1460_v51, 0.0 }
 0x12f   : > { %v1469_v19 = vadd.f32 %v1468_v17, %v1467_v49  ;;  %v3354_v41 = vpop.f32.mrf.mxu0 }
 0x130   : > { %v1470_v43 = vsel %vm259_vm3, %v1459_v56, 0.0  ;;  %v1462_v58 = vadd.f32 %v3354_v41, %v1341_v42 }
 0x131   : > { %v1471_v44 = vadd.f32 %v1470_v43, %v1469_v19  ;;  %v1446_v7 = vpop.f32.mrf.mxu0 }
 0x132   : > { %v1461_v53 = vadd.f32 %v1446_v7, %v1340_v9  ;;  %v1476_v22 = vsel %vm259_vm3, %v1462_v58, 0.0 }
 0x133   : > { %v1473_v55 = vadd.f32 %v1472_v8, %v1471_v44 }
 0x134   : > { %v1474_v21 = vsel %vm259_vm3, %v1461_v53, 0.0 }
 0x135   : > { %v1475_v60 = vadd.f32 %v1474_v21, %v1473_v55 }
 0x137   : > { %v1477_v45 = vadd.f32 %v1476_v22, %v1475_v60 }
 0x139   : > { %v1478_v46 = vrot.slane %v1477_v45, 4 }
 0x13b   : > { %v1479_v25 = vadd.f32 %v1478_v46, %v1477_v45 }
 0x13d   : > { %v1480_v47 = vrot.slane %v1479_v25, 2 }
 0x13f   : > { %v1481_v48 = vadd.f32 %v1480_v47, %v1479_v25 }
 0x141   : > { %v1482_v26 = vrot.slane %v1481_v48, 1 }
 0x143   : > { %v1483_v6 = vadd.f32 %v1482_v26, %v1481_v48 }
 0x145   : > { %v1484_v2 = vmul.f32 0.015625, %v1483_v6 }
 0x147   : > { %v1485_v3 = vsub.f32 %v1455_v11, %v1484_v2  ;;  %v1486_v57 = vsub.f32 %v1456_v4, %v1484_v2  ;;  %v1487_v12 = vsub.f32 %v1457_v15, %v1484_v2  ;;  %v1488_v62 = vsub.f32 %v1458_v50, %v1484_v2 }
 0x148   : > { %v1489_v30 = vsub.f32 %v1459_v56, %v1484_v2  ;;  %v1490_v24 = vsub.f32 %v1460_v51, %v1484_v2  ;;  %v1491_v34 = vsub.f32 %v1461_v53, %v1484_v2  ;;  %v1492_v11 = vsub.f32 %v1462_v58, %v1484_v2 }
 0x149   : > { %v1493_v0 = vmul.f32 %v1485_v3, %v1485_v3  ;;  %v1494_v31 = vmul.f32 %v1486_v57, %v1486_v57  ;;  %v1495_v59 = vmul.f32 %v1487_v12, %v1487_v12  ;;  %v1496_v27 = vmul.f32 %v1488_v62, %v1488_v62 }
 0x14a   : > { %v1497_v61 = vmul.f32 %v1489_v30, %v1489_v30  ;;  %v1498_v4 = vmul.f32 %v1490_v24, %v1490_v24  ;;  %v1499_v32 = vmul.f32 %v1491_v34, %v1491_v34  ;;  %v1500_v18 = vmul.f32 %v1492_v11, %v1492_v11 }
 0x14b   : > { %v1501_v14 = vsel %vm259_vm3, %v1493_v0, 0.0  ;;  %v1502_v33 = vsel %vm259_vm3, %v1494_v31, 0.0  ;;  %v1504_v35 = vsel %vm259_vm3, %v1495_v59, 0.0  ;;  %v1506_v23 = vsel %vm259_vm3, %v1496_v27, 0.0  ;;  %v3027_v31 = vld [vmem:[%s4114_s2 + $0x38] sm:$0xff] }
 0x14c   : > { %v1503_v16 = vadd.f32 %v1502_v33, %v1501_v14  ;;  %v1508_v36 = vsel %vm259_vm3, %v1497_v61, 0.0  ;;  %v1510_v50 = vsel %vm259_vm3, %v1498_v4, 0.0  ;;  %v1512_v20 = vsel %vm259_vm3, %v1499_v32, 0.0  ;;  %v3045_v61 = vld [vmem:[%s4114_s2 + $0x28] sm:$0xff]  ;;  %v3054_v32 = vld [vmem:[%s4114_s2 + $0x40] sm:$0xff] }
 0x14d   : > { %v1514_v37 = vsel %vm259_vm3, %v1500_v18, 0.0  ;;  %v2319_v18 = vld [vmem:[#allocation3 + $0x9] sm:$0xff] }
 0x14e   : > { %v1505_v63 = vadd.f32 %v1504_v35, %v1503_v16 }
 0x150   : > { %v1507_v28 = vadd.f32 %v1506_v23, %v1505_v63  ;;  %v1575_v23 = vld [vmem:[#allocation3 + $0xdf] sm:$0xff] }
 0x152   : > { %v1509_v13 = vadd.f32 %v1508_v36, %v1507_v28 }
 0x154   : > { %v1511_v15 = vadd.f32 %v1510_v50, %v1509_v13  ;;  %v1943_v13 = vld [vmem:[#allocation3 + $0xe0] sm:$0xff] }
 0x156   : > { %v1513_v52 = vadd.f32 %v1512_v20, %v1511_v15 }
 0x158   : > { %v1515_v38 = vadd.f32 %v1514_v37, %v1513_v52 }
 0x15a   : > { %v1516_v39 = vrot.slane %v1515_v38, 4 }
 0x15c   : > { %v1517_v1 = vadd.f32 %v1516_v39, %v1515_v38 }
 0x15e   : > { %v1518_v40 = vrot.slane %v1517_v1, 2 }
 0x160   : > { %v1519_v5 = vadd.f32 %v1518_v40, %v1517_v1  ;;  %v2328_v40 = vld [vmem:[#allocation3 + $0xe1] sm:$0xff] }
 0x162   : > { %v1520_v49 = vrot.slane %v1519_v5, 1 }
 0x164   : > { %v1521_v54 = vadd.f32 %v1520_v49, %v1519_v5 }
 0x166   : > { %v1522_v17 = vmul.f32 0.015625, %v1521_v54 }
 0x168   : > { %v1523_v51 = vadd.f32 1e-05, %v1522_v17 }
 0x16a   : > { %3490 = vrsqrt.f32 %v1523_v51 }
 0x177   : > { %v3491_v56 = vpop.eup %3490 }
 0x178   : > { %v1525_v19 = vmul.f32 %v3491_v56, %v1485_v3  ;;  %v1526_v41 = vmul.f32 %v3491_v56, %v1486_v57  ;;  %v1527_v42 = vmul.f32 %v3491_v56, %v1487_v12  ;;  %v1528_v9 = vmul.f32 %v3491_v56, %v1488_v62 }
 0x179   : > { %v1529_v43 = vmul.f32 %v3491_v56, %v1489_v30  ;;  %v1530_v44 = vmul.f32 %v3491_v56, %v1490_v24  ;;  %v1531_v7 = vmul.f32 %v3491_v56, %v1491_v34  ;;  %v1532_v8 = vmul.f32 %v3491_v56, %v1492_v11  ;;  %v3018_v30 = vld [vmem:[%s4114_s2 + $0x20] sm:$0xff]  ;;  %v3036_v34 = vld [vmem:[%s4114_s2 + $0x10] sm:$0xff] }
 0x17a   : > { %vm1533_vm5 = vcmp.ge.f32.partialorder %v1525_v19, 0.0  ;;  %vm1534_vm6 = vcmp.ge.f32.partialorder %v1526_v41, 0.0  ;;  %vm1535_vm7 = vcmp.ge.f32.partialorder %v1527_v42, 0.0  ;;  %vm1536_vm8 = vcmp.ge.f32.partialorder %v1528_v9, 0.0 }
 0x17b   : > { %vm1537_vm9 = vcmp.ge.f32.partialorder %v1529_v43, 0.0  ;;  %vm1538_vm10 = vcmp.ge.f32.partialorder %v1530_v44, 0.0  ;;  %vm1539_vm11 = vcmp.ge.f32.partialorder %v1531_v7, 0.0  ;;  %vm1540_vm12 = vcmp.ge.f32.partialorder %v1532_v8, 0.0 }
 0x17c   : > { %v1541_v58 = vmul.f32 0.01, %v1525_v19  ;;  %v1542_v53 = vmul.f32 0.01, %v1526_v41  ;;  %v1543_v55 = vmul.f32 0.01, %v1527_v42 }
 0x17d   : > { %v1544_v21 = vmul.f32 0.01, %v1528_v9  ;;  %v1545_v60 = vmul.f32 0.01, %v1529_v43  ;;  %v1546_v22 = vmul.f32 0.01, %v1530_v44 }
 0x17e   : > { %v1547_v45 = vmul.f32 0.01, %v1531_v7  ;;  %v1548_v46 = vmul.f32 0.01, %v1532_v8  ;;  %v1549_v25 = vsel %vm1533_vm5, %v1525_v19, %v1541_v58  ;;  %v1550_v47 = vsel %vm1534_vm6, %v1526_v41, %v1542_v53 }
 0x17f   : > { %v1551_v48 = vsel %vm1535_vm7, %v1527_v42, %v1543_v55  ;;  %v1552_v26 = vsel %vm1536_vm8, %v1528_v9, %v1544_v21  ;;  %v1553_v6 = vsel %vm1537_vm9, %v1529_v43, %v1545_v60  ;;  %v1554_v2 = vsel %vm1538_vm10, %v1530_v44, %v1546_v22  ;;  %1558 = vst.msk [vmem:[#allocation3 + $0x20] sm:$0xff] %vm259_vm3, %v1549_v25 }
 0x180   : > { %1559 = vst.msk [vmem:[#allocation3 + $0x38] sm:$0xff] %vm259_vm3, %v1550_v47  ;;  %v1555_v3 = vsel %vm1539_vm11, %v1531_v7, %v1547_v45  ;;  %v1556_v57 = vsel %vm1540_vm12, %v1532_v8, %v1548_v46  ;;  %1560 = vst.msk [vmem:[#allocation3 + $0x50] sm:$0xff] %vm259_vm3, %v1551_v48 }
 0x181   : > { %1561 = vst.msk [vmem:[#allocation3 + $0x68] sm:$0xff] %vm259_vm3, %v1552_v26  ;;  %1562 = vst.msk [vmem:[#allocation3 + $0x80] sm:$0xff] %vm259_vm3, %v1553_v6 }
 0x182   : > { %1563 = vst.msk [vmem:[#allocation3 + $0x98] sm:$0xff] %vm259_vm3, %v1554_v2  ;;  %1564 = vst.msk [vmem:[#allocation3 + $0xb0] sm:$0xff] %vm259_vm3, %v1555_v3 }
 0x183   : > { %1565 = vst.msk [vmem:[#allocation3 + $0xc8] sm:$0xff] %vm259_vm3, %v1556_v57 }
 0x186   : > { %v1567_v12 = vld [vmem:[#allocation3 + $0x1f] sm:$0xff] }
 0x187   : > { %v1568_v62 = vld [vmem:[#allocation3 + $0x37] sm:$0xff]  ;;  %3357 = vmatprep.mubr.msk.f32.mxu1 %vm259_vm3, %v1567_v12  ;;  %3372 = vmatmul.mubr.msk.f32.vlgmr.msra.gmra.mxu0 %vm259_vm3, %v1567_v12  ;;  %v1569_v0 = vld [vmem:[#allocation3 + $0x4f] sm:$0xff]  ;;  %v1935_v33 = vld [vmem:[#allocation3 + $0x20] sm:$0xff] }
 0x188   : > { %3358 = vmatmul.mubr.msk.f32.vlgmr.msra.gmra.mxu1 %vm259_vm3, %v1568_v62  ;;  %3374 = vmatprep.mubr.msk.f32.mxu0 %vm259_vm3, %v1568_v62  ;;  %v1570_v59 = vld [vmem:[#allocation3 + $0x67] sm:$0xff]  ;;  %v1571_v24 = vld [vmem:[#allocation3 + $0x7f] sm:$0xff]  ;;  %v1937_v35 = vld [vmem:[#allocation3 + $0x50] sm:$0xff] }
 0x189   : > { %3384 = vmatpush3.msra.mxu1 %v3881_v10  ;;  %3360 = vmatprep.mubr.msk.f32.mxu1 %vm259_vm3, %v1569_v0  ;;  %v1572_v27 = vld [vmem:[#allocation3 + $0x97] sm:$0xff]  ;;  %v1573_v10 = vld [vmem:[#allocation3 + $0xaf] sm:$0xff]  ;;  %v1939_v11 = vld [vmem:[#allocation3 + $0x80] sm:$0xff] }
 0x18a   : > { %3398 = vmatpush3.msra.mxu0 %v3902_v29  ;;  %3411 = vmatprep.subr.mxu1 %v3018_v30  ;;  %v1934_v29 = vld [vmem:[#allocation3 + $0x8] sm:$0xff]  ;;  %v1936_v16 = vld [vmem:[#allocation3 + $0x38] sm:$0xff]  ;;  %v1941_v28 = vld [vmem:[#allocation3 + $0xb0] sm:$0xff] }
 0x18b   : > { %3375 = vmatmul.mubr.msk.f32.gmra.mxu0 %vm259_vm3, %v1569_v0  ;;  %3425 = vmatprep.subr.mxu0 %v3027_v31  ;;  %v1574_v14 = vld [vmem:[#allocation3 + $0xc7] sm:$0xff]  ;;  %v1940_v4 = vld [vmem:[#allocation3 + $0x98] sm:$0xff] }
 0x18c   : > { %3361 = vmatmul.mubr.msk.f32.gmra.mxu1 %vm259_vm3, %v1570_v59  ;;  %3377 = vmatprep.mubr.msk.f32.mxu0 %vm259_vm3, %v1570_v59  ;;  %v1938_v63 = vld [vmem:[#allocation3 + $0x68] sm:$0xff]  ;;  %v2321_v15 = vld [vmem:[#allocation3 + $0x39] sm:$0xff]  ;;  %v2322_v20 = vld [vmem:[#allocation3 + $0x51] sm:$0xff] }
 0x18d   : > { %3363 = vmatprep.mubr.msk.f32.mxu1 %vm259_vm3, %v1571_v24  ;;  %v1942_v36 = vld [vmem:[#allocation3 + $0xc8] sm:$0xff]  ;;  %v2325_v38 = vld [vmem:[#allocation3 + $0x99] sm:$0xff]  ;;  %v2326_v39 = vld [vmem:[#allocation3 + $0xb1] sm:$0xff] }
 0x18e   : > { %v2320_v50 = vld [vmem:[#allocation3 + $0x21] sm:$0xff]  ;;  %v2323_v52 = vld [vmem:[#allocation3 + $0x69] sm:$0xff] }
 0x18f   : > { %3378 = vmatmul.mubr.msk.f32.gmra.mxu0 %vm259_vm3, %v1571_v24  ;;  %v2324_v37 = vld [vmem:[#allocation3 + $0x81] sm:$0xff]  ;;  %v2327_v1 = vld [vmem:[#allocation3 + $0xc9] sm:$0xff] }
 0x190   : > { %3364 = vmatmul.mubr.msk.f32.gmra.mxu1 %vm259_vm3, %v1572_v27  ;;  %3380 = vmatprep.mubr.msk.f32.mxu0 %vm259_vm3, %v1572_v27 }
 0x191   : > { %3366 = vmatprep.mubr.msk.f32.mxu1 %vm259_vm3, %v1573_v10 }
 0x193   : > { %3381 = vmatmul.mubr.msk.f32.gmra.mxu0 %vm259_vm3, %v1573_v10 }
 0x194   : > { %3367 = vmatmul.mubr.msk.f32.gmra.mxu1 %vm259_vm3, %v1574_v14  ;;  %3399 = vmatprep.mubr.msk.f32.mxu0 %vm259_vm3, %v1934_v29 }
 0x195   : > { %3385 = vmatprep.mubr.msk.f32.mxu1 %vm259_vm3, %v1568_v62 }
 0x197   : > { %3400 = vmatmul.mubr.msk.f32.vlgmr.msra.gmra.mxu0 %vm259_vm3, %v1935_v33 }
 0x198   : > { %3386 = vmatmul.mubr.msk.f32.vlgmr.msra.gmra.mxu1 %vm259_vm3, %v1569_v0  ;;  %3402 = vmatprep.mubr.msk.f32.mxu0 %vm259_vm3, %v1936_v16 }
 0x199   : > { %3412 = vmatpush3.msra.mxu1 %v3018_v30  ;;  %3388 = vmatprep.mubr.msk.f32.mxu1 %vm259_vm3, %v1570_v59 }
 0x19a   : > { %3426 = vmatpush3.msra.mxu0 %v3027_v31  ;;  %3439 = vmatprep.subr.mxu1 %v3036_v34 }
 0x19b   : > { %3403 = vmatmul.mubr.msk.f32.gmra.mxu0 %vm259_vm3, %v1937_v35  ;;  %3453 = vmatprep.subr.mxu0 %v3045_v61 }
 0x19c   : > { %3389 = vmatmul.mubr.msk.f32.gmra.mxu1 %vm259_vm3, %v1571_v24  ;;  %3405 = vmatprep.mubr.msk.f32.mxu0 %vm259_vm3, %v1938_v63 }
 0x19d   : > { %3391 = vmatprep.mubr.msk.f32.mxu1 %vm259_vm3, %v1572_v27 }
 0x19f   : > { %3406 = vmatmul.mubr.msk.f32.gmra.mxu0 %vm259_vm3, %v1939_v11 }
 0x1a0   : > { %3392 = vmatmul.mubr.msk.f32.gmra.mxu1 %vm259_vm3, %v1573_v10  ;;  %3408 = vmatprep.mubr.msk.f32.mxu0 %vm259_vm3, %v1940_v4 }
 0x1a1   : > { %3394 = vmatprep.mubr.msk.f32.mxu1 %vm259_vm3, %v1574_v14 }
 0x1a3   : > { %3409 = vmatmul.mubr.msk.f32.gmra.mxu0 %vm259_vm3, %v1941_v28 }
 0x1a4   : > { %3395 = vmatmul.mubr.msk.f32.gmra.mxu1 %vm259_vm3, %v1575_v23  ;;  %3427 = vmatprep.mubr.msk.f32.mxu0 %vm259_vm3, %v1936_v16 }
 0x1a5   : > { %3413 = vmatprep.mubr.msk.f32.mxu1 %vm259_vm3, %v1935_v33 }
 0x1a7   : > { %3428 = vmatmul.mubr.msk.f32.vlgmr.msra.gmra.mxu0 %vm259_vm3, %v1937_v35 }
 0x1a8   : > { %3414 = vmatmul.mubr.msk.f32.vlgmr.msra.gmra.mxu1 %vm259_vm3, %v1936_v16  ;;  %3430 = vmatprep.mubr.msk.f32.mxu0 %vm259_vm3, %v1938_v63 }
 0x1a9   : > { %3440 = vmatpush3.msra.mxu1 %v3036_v34  ;;  %3416 = vmatprep.mubr.msk.f32.mxu1 %vm259_vm3, %v1937_v35 }
 0x1aa   : > { %3454 = vmatpush3.msra.mxu0 %v3045_v61  ;;  %3467 = vmatprep.subr.mxu1 %v3054_v32 }
 0x1ab   : > { %3431 = vmatmul.mubr.msk.f32.gmra.mxu0 %vm259_vm3, %v1939_v11 }
 0x1ac   : > { %3417 = vmatmul.mubr.msk.f32.gmra.mxu1 %vm259_vm3, %v1938_v63  ;;  %3433 = vmatprep.mubr.msk.f32.mxu0 %vm259_vm3, %v1940_v4 }
 0x1ad   : > { %3419 = vmatprep.mubr.msk.f32.mxu1 %vm259_vm3, %v1939_v11 }
 0x1af   : > { %3434 = vmatmul.mubr.msk.f32.gmra.mxu0 %vm259_vm3, %v1941_v28 }
 0x1b0   : > { %3420 = vmatmul.mubr.msk.f32.gmra.mxu1 %vm259_vm3, %v1940_v4  ;;  %3436 = vmatprep.mubr.msk.f32.mxu0 %vm259_vm3, %v1942_v36 }
 0x1b1   : > { %3422 = vmatprep.mubr.msk.f32.mxu1 %vm259_vm3, %v1941_v28 }
 0x1b3   : > { %3437 = vmatmul.mubr.msk.f32.gmra.mxu0 %vm259_vm3, %v1943_v13 }
 0x1b4   : > { %3423 = vmatmul.mubr.msk.f32.gmra.mxu1 %vm259_vm3, %v1942_v36  ;;  %3455 = vmatprep.mubr.msk.f32.mxu0 %vm259_vm3, %v2320_v50 }
 0x1b5   : > { %3441 = vmatprep.mubr.msk.f32.mxu1 %vm259_vm3, %v2319_v18 }
 0x1b7   : > { %3456 = vmatmul.mubr.msk.f32.vlgmr.msra.gmra.mxu0 %vm259_vm3, %v2321_v15 }
 0x1b8   : > { %3442 = vmatmul.mubr.msk.f32.vlgmr.msra.gmra.mxu1 %vm259_vm3, %v2320_v50  ;;  %3458 = vmatprep.mubr.msk.f32.mxu0 %vm259_vm3, %v2322_v20 }
 0x1b9   : > { %3468 = vmatpush3.msra.mxu1 %v3054_v32  ;;  %3444 = vmatprep.mubr.msk.f32.mxu1 %vm259_vm3, %v2321_v15 }
 0x1bb   : > { %3459 = vmatmul.mubr.msk.f32.gmra.mxu0 %vm259_vm3, %v2323_v52 }
 0x1bc   : > { %3445 = vmatmul.mubr.msk.f32.gmra.mxu1 %vm259_vm3, %v2322_v20  ;;  %3461 = vmatprep.mubr.msk.f32.mxu0 %vm259_vm3, %v2324_v37 }
 0x1bd   : > { %3447 = vmatprep.mubr.msk.f32.mxu1 %vm259_vm3, %v2323_v52 }
 0x1bf   : > { %3462 = vmatmul.mubr.msk.f32.gmra.mxu0 %vm259_vm3, %v2325_v38 }
 0x1c0   : > { %3448 = vmatmul.mubr.msk.f32.gmra.mxu1 %vm259_vm3, %v2324_v37  ;;  %3464 = vmatprep.mubr.msk.f32.mxu0 %vm259_vm3, %v2326_v39 }
 0x1c1   : > { %3450 = vmatprep.mubr.msk.f32.mxu1 %vm259_vm3, %v2325_v38 }
 0x1c3   : > { %3465 = vmatmul.mubr.msk.f32.gmra.mxu0 %vm259_vm3, %v2327_v1 }
 0x1c4   : > { %3451 = vmatmul.mubr.msk.f32.gmra.mxu1 %vm259_vm3, %v2326_v39 }
 0x1c5   : > { %3469 = vmatprep.mubr.msk.f32.mxu1 %vm259_vm3, %v2321_v15 }
 0x1c8   : > { %3470 = vmatmul.mubr.msk.f32.vlgmr.msra.gmra.mxu1 %vm259_vm3, %v2322_v20 }
 0x1c9   : > { %3472 = vmatprep.mubr.msk.f32.mxu1 %vm259_vm3, %v2323_v52 }
 0x1cc   : > { %3473 = vmatmul.mubr.msk.f32.gmra.mxu1 %vm259_vm3, %v2324_v37 }
 0x1cd   : > { %3475 = vmatprep.mubr.msk.f32.mxu1 %vm259_vm3, %v2325_v38 }
 0x1d0   : > { %3476 = vmatmul.mubr.msk.f32.gmra.mxu1 %vm259_vm3, %v2326_v39 }
 0x1d1   : > { %3478 = vmatprep.mubr.msk.f32.mxu1 %vm259_vm3, %v2327_v1 }
 0x1d4   : > { %3479 = vmatmul.mubr.msk.f32.gmra.mxu1 %vm259_vm3, %v2328_v40 }
 0x247   : > { %v3373_v5 = vpop.f32.mrf.mxu0 }
 0x248   : > { %v3359_v49 = vpop.f32.mrf.mxu1 }
 0x249   : > { %v1777_v54 = vpop.f32.mrf.mxu0  ;;  %v1783_v4 = vadd.f32 %v3373_v5, %v3359_v49 }
 0x24a   : > { %v1669_v17 = vpop.f32.mrf.mxu1 }
 0x24b   : > { %v3376_v51 = vpop.f32.mrf.mxu0  ;;  %v1778_v23 = vadd.f32 %v1777_v54, %v1669_v17 }
 0x24c   : > { %v3362_v56 = vpop.f32.mrf.mxu1 }
 0x24d   : > { %v1787_v19 = vpop.f32.mrf.mxu0  ;;  %v1793_v50 = vadd.f32 %v3376_v51, %v3362_v56 }
 0x24e   : > { %v1679_v41 = vpop.f32.mrf.mxu1 }
 0x24f   : > { %v3379_v42 = vpop.f32.mrf.mxu0  ;;  %v1788_v15 = vadd.f32 %v1787_v19, %v1679_v41 }
 0x250   : > { %v3365_v9 = vpop.f32.mrf.mxu1 }
 0x251   : > { %v1797_v43 = vpop.f32.mrf.mxu0  ;;  %v1803_v40 = vadd.f32 %v3379_v42, %v3365_v9 }
 0x252   : > { %v1689_v44 = vpop.f32.mrf.mxu1 }
 0x253   : > { %v3382_v7 = vpop.f32.mrf.mxu0 }
 0x254   : > { %v3368_v8 = vpop.f32.mrf.mxu1 }
 0x255   : > { %v1807_v58 = vpop.f32.mrf.mxu0 }
 0x256   : > { %v1699_v53 = vpop.f32.mrf.mxu1 }
 0x257   : > { %v3401_v55 = vpop.f32.mrf.mxu0  ;;  %v1808_v51 = vadd.f32 %v1807_v58, %v1699_v53 }
 0x258   : > { %v3387_v21 = vpop.f32.mrf.mxu1 }
 0x259   : > { %v2036_v60 = vpop.f32.mrf.mxu0  ;;  %v1927_v36 = vadd.f32 %v3387_v21, %v1783_v4  ;;  %v1813_v4 = vadd.f32 %v3382_v7, %v3368_v8 }
 0x25a   : > { %v1887_v22 = vpop.f32.mrf.mxu1 }
 0x25b   : > { %v3404_v45 = vpop.f32.mrf.mxu0  ;;  %v1926_v13 = vadd.f32 %v1887_v22, %v1778_v23  ;;  %v2076_v39 = vadd.f32 %v3401_v55, %v1927_v36 }
 0x25c   : > { %v3390_v46 = vpop.f32.mrf.mxu1 }
 0x25d   : > { %v2046_v25 = vpop.f32.mrf.mxu0  ;;  %v1929_v37 = vadd.f32 %v3390_v46, %v1793_v50  ;;  %v2075_v1 = vadd.f32 %v2036_v60, %v1926_v13 }
 0x25e   : > { %v1897_v47 = vpop.f32.mrf.mxu1 }
 0x25f   : > { %v3407_v48 = vpop.f32.mrf.mxu0  ;;  %v1928_v38 = vadd.f32 %v1897_v47, %v1788_v15  ;;  %v2078_v21 = vadd.f32 %v3404_v45, %v1929_v37 }
 0x260   : > { %v3393_v26 = vpop.f32.mrf.mxu1 }
 0x261   : > { %v2056_v6 = vpop.f32.mrf.mxu0  ;;  %v1931_v5 = vadd.f32 %v3393_v26, %v1803_v40  ;;  %v2077_v22 = vadd.f32 %v2046_v25, %v1928_v38 }
 0x262   : > { %v1907_v2 = vpop.f32.mrf.mxu1 }
 0x263   : > { %v4055_v3 = vpop.f32.mrf.mxu0  ;;  %v2080_v42 = vadd.f32 %v3407_v48, %v1931_v5 }
 0x264   : > { %v3396_v57 = vpop.f32.mrf.mxu1 }
 0x265   : > { %v4057_v12 = vpop.f32.mrf.mxu0  ;;  %v1933_v55 = vadd.f32 %v3396_v57, %v1813_v4 }
 0x266   : > { %v1917_v62 = vpop.f32.mrf.mxu1 }
 0x267   : > { %v3429_v30 = vpop.f32.mrf.mxu0  ;;  %v1932_v60 = vadd.f32 %v1917_v62, %v1808_v51  ;;  %v2082_v7 = vadd.f32 %v4055_v3, %v1933_v55 }
 0x268   : > { %v3415_v0 = vpop.f32.mrf.mxu1 }
 0x269   : > { %v2272_v31 = vpop.f32.mrf.mxu0  ;;  %v2081_v8 = vadd.f32 %v4057_v12, %v1932_v60 }
 0x26a   : > { %v2154_v59 = vpop.f32.mrf.mxu1 }
 0x26b   : > { %v3432_v24 = vpop.f32.mrf.mxu0 }
 0x26c   : > { %v3418_v27 = vpop.f32.mrf.mxu1 }
 0x26d   : > { %v2282_v10 = vpop.f32.mrf.mxu0  ;;  %v2196_v19 = vadd.f32 %v3418_v27, %v2078_v21 }
 0x26e   : > { %v2164_v29 = vpop.f32.mrf.mxu1 }
 0x26f   : > { %v4059_v14 = vpop.f32.mrf.mxu0  ;;  %v2195_v41 = vadd.f32 %v2164_v29, %v2077_v22  ;;  %v2314_v45 = vadd.f32 %v3432_v24, %v2196_v19 }
 0x270   : > { %4116 = vst [vmem:[#allocation4_spill] sm:$0xff] %v4059_v14  ;;  %v3421_v33 = vpop.f32.mrf.mxu1  ;;  %v2193_v14 = vadd.f32 %v2154_v59, %v2075_v1 }
 0x271   : > { %v4061_v16 = vpop.f32.mrf.mxu0  ;;  %v2198_v59 = vadd.f32 %v3421_v33, %v2080_v42  ;;  %v2313_v25 = vadd.f32 %v2282_v10, %v2195_v41 }
 0x272   : > { %4117 = vst [vmem:[#allocation5_spill] sm:$0xff] %v4061_v16  ;;  %v2174_v34 = vpop.f32.mrf.mxu1  ;;  %v1798_v16 = vadd.f32 %v1797_v43, %v1689_v44  ;;  %v2311_v47 = vadd.f32 %v2272_v31, %v2193_v14 }
 0x273   : > { %v4063_v61 = vpop.f32.mrf.mxu0 }
 0x274   : > { %4118 = vst [vmem:[#allocation6_spill] sm:$0xff] %v4063_v61  ;;  %v3424_v35 = vpop.f32.mrf.mxu1  ;;  %v1930_v17 = vadd.f32 %v1907_v2, %v1798_v16 }
 0x275   : > { %v4065_v63 = vpop.f32.mrf.mxu0  ;;  %v2200_v31 = vadd.f32 %v3424_v35, %v2082_v7 }
 0x276   : > { %4119 = vst [vmem:[#allocation7_spill] sm:$0xff] %v4065_v63  ;;  %v2184_v11 = vpop.f32.mrf.mxu1  ;;  %v2194_v63 = vadd.f32 %v3415_v0, %v2076_v39  ;;  %v2079_v44 = vadd.f32 %v2056_v6, %v1930_v17 }
 0x277   : > { %v3457_v28 = vpop.f32.mrf.mxu0  ;;  %v4120_v27 = vld [vmem:[#allocation4_spill] sm:$0xff]  ;;  %v2199_v14 = vadd.f32 %v2184_v11, %v2081_v8 }
 0x278   : > { %v3443_v32 = vpop.f32.mrf.mxu1  ;;  %v2312_v46 = vadd.f32 %v3429_v30, %v2194_v63  ;;  %v2197_v2 = vadd.f32 %v2174_v34, %v2079_v44  ;;  %v2316_v6 = vadd.f32 %v4120_v27, %v2198_v59 }
 0x279   : > { %v2539_v20 = vpop.f32.mrf.mxu0  ;;  %v4121_v33 = vld [vmem:[#allocation5_spill] sm:$0xff] }
 0x27a   : > { %v2421_v18 = vpop.f32.mrf.mxu1  ;;  %v2461_v0 = vadd.f32 %v3443_v32, %v2312_v46  ;;  %v2315_v16 = vadd.f32 %v4121_v33, %v2197_v2 }
 0x27b   : > { %v3460_v49 = vpop.f32.mrf.mxu0  ;;  %v2460_v26 = vadd.f32 %v2421_v18, %v2311_v47 }
 0x27c   : > { %v3446_v52 = vpop.f32.mrf.mxu1  ;;  %v2579_v62 = vadd.f32 %v3457_v28, %v2461_v0 }
 0x27d   : > { %v2549_v9 = vpop.f32.mrf.mxu0  ;;  %v2463_v30 = vadd.f32 %v3446_v52, %v2314_v45  ;;  %v2578_v48 = vadd.f32 %v2539_v20, %v2460_v26  ;;  %v4123_v35 = vld [vmem:[#allocation7_spill] sm:$0xff] }
 0x27e   : > { %v2431_v61 = vpop.f32.mrf.mxu1  ;;  %v2317_v50 = vadd.f32 %v4123_v35, %v2199_v14 }
 0x27f   : > { %v3463_v58 = vpop.f32.mrf.mxu0  ;;  %v2462_v57 = vadd.f32 %v2431_v61, %v2313_v25  ;;  %v2581_v36 = vadd.f32 %v3460_v49, %v2463_v30  ;;  %v4122_v61 = vld [vmem:[#allocation6_spill] sm:$0xff] }
 0x280   : > { %v3449_v54 = vpop.f32.mrf.mxu1  ;;  %v2318_v28 = vadd.f32 %v4122_v61, %v2200_v31 }
 0x281   : > { %v2465_v10 = vadd.f32 %v3449_v54, %v2316_v6  ;;  %v2559_v63 = vpop.f32.mrf.mxu0  ;;  %v2580_v13 = vadd.f32 %v2549_v9, %v2462_v57 }
 0x282   : > { %v2441_v56 = vpop.f32.mrf.mxu1 }
 0x283   : > { %v2464_v32 = vadd.f32 %v2441_v56, %v2315_v16  ;;  %v3466_v52 = vpop.f32.mrf.mxu0  ;;  %v2583_v38 = vadd.f32 %v3463_v58, %v2465_v10 }
 0x284   : > { %v3452_v43 = vpop.f32.mrf.mxu1 }
 0x285   : > { %v2467_v1 = vadd.f32 %v3452_v43, %v2318_v28  ;;  %v2582_v54 = vadd.f32 %v2559_v63, %v2464_v32  ;;  %v2569_v51 = vpop.f32.mrf.mxu0 }
 0x286   : > { %v2451_v23 = vpop.f32.mrf.mxu1 }
 0x287   : > { %v2466_v40 = vadd.f32 %v2451_v23, %v2317_v50  ;;  %v2585_v46 = vadd.f32 %v3466_v52, %v2467_v1 }
 0x288   : > { %v3471_v53 = vpop.f32.mrf.mxu1 }
 0x289   : > { %v2697_v34 = vadd.f32 %v3471_v53, %v2579_v62  ;;  %v2584_v47 = vadd.f32 %v2569_v51, %v2466_v40 }
 0x28a   : > { %v2657_v29 = vpop.f32.mrf.mxu1 }
 0x28b   : > { %v2696_v24 = vadd.f32 %v2657_v29, %v2578_v48  ;;  %v2705_v15 = vsel %vm259_vm3, %v2697_v34, 0.0 }
 0x28c   : > { %v3474_v3 = vpop.f32.mrf.mxu1 }
 0x28d   : > { %v2704_v12 = vsel %vm259_vm3, %v2696_v24, 0.0  ;;  %v2699_v11 = vadd.f32 %v3474_v3, %v2581_v36 }
 0x28e   : > { %v2667_v18 = vpop.f32.mrf.mxu1  ;;  %v2706_v37 = vadd.f32 %v2705_v15, %v2704_v12 }
 0x28f   : > { %v2698_v20 = vadd.f32 %v2667_v18, %v2580_v13  ;;  %v2709_v21 = vsel %vm259_vm3, %v2699_v11, 0.0 }
 0x290   : > { %v3477_v39 = vpop.f32.mrf.mxu1 }
 0x291   : > { %v2707_v5 = vsel %vm259_vm3, %v2698_v20, 0.0  ;;  %v2701_v22 = vadd.f32 %v3477_v39, %v2583_v38 }
 0x292   : > { %v2708_v49 = vadd.f32 %v2707_v5, %v2706_v37  ;;  %v2677_v17 = vpop.f32.mrf.mxu1 }
 0x293   : > { %v2700_v4 = vadd.f32 %v2677_v17, %v2582_v54  ;;  %v2713_v42 = vsel %vm259_vm3, %v2701_v22, 0.0 }
 0x294   : > { %v2710_v56 = vadd.f32 %v2709_v21, %v2708_v49  ;;  %v3480_v19 = vpop.f32.mrf.mxu1 }
 0x295   : > { %v2711_v41 = vsel %vm259_vm3, %v2700_v4, 0.0  ;;  %v2703_v9 = vadd.f32 %v3480_v19, %v2585_v46 }
 0x296   : > { %v2712_v55 = vadd.f32 %v2711_v41, %v2710_v56  ;;  %v2687_v60 = vpop.f32.mrf.mxu1 }
 0x297   : > { %v2702_v43 = vadd.f32 %v2687_v60, %v2584_v47  ;;  %v2717_v59 = vsel %vm259_vm3, %v2703_v9, 0.0 }
 0x298   : > { %v2714_v44 = vadd.f32 %v2713_v42, %v2712_v55 }
 0x299   : > { %v2715_v0 = vsel %vm259_vm3, %v2702_v43, 0.0 }
 0x29a   : > { %v2716_v26 = vadd.f32 %v2715_v0, %v2714_v44 }
 0x29c   : > { %v2718_v23 = vadd.f32 %v2717_v59, %v2716_v26 }
 0x29e   : > { %v2719_v2 = vrot.slane %v2718_v23, 4 }
 0x2a0   : > { %v2720_v45 = vadd.f32 %v2719_v2, %v2718_v23 }
 0x2a2   : > { %v2721_v25 = vrot.slane %v2720_v45, 2 }
 0x2a4   : > { %v2722_v7 = vadd.f32 %v2721_v25, %v2720_v45 }
 0x2a6   : > { %v2723_v8 = vrot.slane %v2722_v7, 1 }
 0x2a8   : > { %v2724_v58 = vadd.f32 %v2723_v8, %v2722_v7 }
 0x2aa   : > { %v2725_v53 = vmul.f32 0.015625, %v2724_v58 }
 0x2ac   : > { %v2726_v30 = vsub.f32 %v2696_v24, %v2725_v53  ;;  %v2727_v57 = vsub.f32 %v2697_v34, %v2725_v53  ;;  %v2728_v62 = vsub.f32 %v2698_v20, %v2725_v53  ;;  %v2729_v48 = vsub.f32 %v2699_v11, %v2725_v53 }
 0x2ad   : > { %v2730_v31 = vsub.f32 %v2700_v4, %v2725_v53  ;;  %v2731_v14 = vsub.f32 %v2701_v22, %v2725_v53  ;;  %v2732_v3 = vsub.f32 %v2702_v43, %v2725_v53  ;;  %v2733_v24 = vsub.f32 %v2703_v9, %v2725_v53 }
 0x2ae   : > { %v2734_v27 = vmul.f32 %v2726_v30, %v2726_v30  ;;  %v2735_v6 = vmul.f32 %v2727_v57, %v2727_v57  ;;  %v2736_v29 = vmul.f32 %v2728_v62, %v2728_v62  ;;  %v2737_v33 = vmul.f32 %v2729_v48, %v2729_v48 }
 0x2af   : > { %v2738_v32 = vmul.f32 %v2730_v31, %v2730_v31  ;;  %v2739_v34 = vmul.f32 %v2731_v14, %v2731_v14  ;;  %v2740_v28 = vmul.f32 %v2732_v3, %v2732_v3  ;;  %v2741_v50 = vmul.f32 %v2733_v24, %v2733_v24 }
 0x2b0   : > { %v2742_v16 = vsel %vm259_vm3, %v2734_v27, 0.0  ;;  %v2743_v10 = vsel %vm259_vm3, %v2735_v6, 0.0  ;;  %v2745_v12 = vsel %vm259_vm3, %v2736_v29, 0.0  ;;  %v2747_v13 = vsel %vm259_vm3, %v2737_v33, 0.0 }
 0x2b1   : > { %v2744_v63 = vadd.f32 %v2743_v10, %v2742_v16  ;;  %v2749_v18 = vsel %vm259_vm3, %v2738_v32, 0.0  ;;  %v2751_v15 = vsel %vm259_vm3, %v2739_v34, 0.0  ;;  %v2753_v20 = vsel %vm259_vm3, %v2740_v28, 0.0 }
 0x2b2   : > { %v2755_v37 = vsel %vm259_vm3, %v2741_v50, 0.0 }
 0x2b3   : > { %v2746_v36 = vadd.f32 %v2745_v12, %v2744_v63 }
 0x2b5   : > { %v2748_v61 = vadd.f32 %v2747_v13, %v2746_v36 }
 0x2b7   : > { %v2750_v35 = vadd.f32 %v2749_v18, %v2748_v61 }
 0x2b9   : > { %v2752_v11 = vadd.f32 %v2751_v15, %v2750_v35 }
 0x2bb   : > { %v2754_v52 = vadd.f32 %v2753_v20, %v2752_v11 }
 0x2bd   : > { %v2756_v38 = vadd.f32 %v2755_v37, %v2754_v52 }
 0x2bf   : > { %v2757_v39 = vrot.slane %v2756_v38, 4 }
 0x2c1   : > { %v2758_v1 = vadd.f32 %v2757_v39, %v2756_v38 }
 0x2c3   : > { %v2759_v40 = vrot.slane %v2758_v1, 2 }
 0x2c5   : > { %v2760_v5 = vadd.f32 %v2759_v40, %v2758_v1 }
 0x2c7   : > { %v2761_v54 = vrot.slane %v2760_v5, 1 }
 0x2c9   : > { %v2762_v49 = vadd.f32 %v2761_v54, %v2760_v5 }
 0x2cb   : > { %v2763_v17 = vmul.f32 0.015625, %v2762_v49 }
 0x2cd   : > { %v2764_v21 = vadd.f32 1e-05, %v2763_v17 }
 0x2cf   : > { %3492 = vrsqrt.f32 %v2764_v21 }
 0x2dc   : > { %v3493_v22 = vpop.eup %3492 }
 0x2dd   : > { %v2766_v4 = vmul.f32 %v3493_v22, %v2726_v30  ;;  %v2767_v51 = vmul.f32 %v3493_v22, %v2727_v57  ;;  %v2768_v56 = vmul.f32 %v3493_v22, %v2728_v62  ;;  %v2769_v19 = vmul.f32 %v3493_v22, %v2729_v48 }
 0x2de   : > { %v2770_v41 = vmul.f32 %v3493_v22, %v2730_v31  ;;  %v2771_v46 = vmul.f32 %v3493_v22, %v2731_v14  ;;  %v2772_v47 = vmul.f32 %v3493_v22, %v2732_v3  ;;  %v2773_v55 = vmul.f32 %v3493_v22, %v2733_v24 }
 0x2df   : > { %vm2774_vm13 = vcmp.ge.f32.partialorder %v2766_v4, 0.0  ;;  %vm2775_vm14 = vcmp.ge.f32.partialorder %v2767_v51, 0.0  ;;  %vm2776_vm15 = vcmp.ge.f32.partialorder %v2768_v56, 0.0  ;;  %vm2777_vm0 = vcmp.ge.f32.partialorder %v2769_v19, 0.0 }
 0x2e0   : > { %vm2778_vm1 = vcmp.ge.f32.partialorder %v2770_v41, 0.0  ;;  %vm2779_vm2 = vcmp.ge.f32.partialorder %v2771_v46, 0.0  ;;  %vm2780_vm4 = vcmp.ge.f32.partialorder %v2772_v47, 0.0  ;;  %vm2781_vm5 = vcmp.ge.f32.partialorder %v2773_v55, 0.0 }
 0x2e1   : > { %v2782_v60 = vmul.f32 0.01, %v2766_v4  ;;  %v2783_v42 = vmul.f32 0.01, %v2767_v51  ;;  %v2784_v9 = vmul.f32 0.01, %v2768_v56 }
 0x2e2   : > { %v2785_v43 = vmul.f32 0.01, %v2769_v19  ;;  %v2786_v44 = vmul.f32 0.01, %v2770_v41  ;;  %v2787_v0 = vmul.f32 0.01, %v2771_v46 }
 0x2e3   : > { %v2788_v26 = vmul.f32 0.01, %v2772_v47  ;;  %v2789_v59 = vmul.f32 0.01, %v2773_v55  ;;  %v2790_v23 = vsel %vm2774_vm13, %v2766_v4, %v2782_v60  ;;  %v2791_v2 = vsel %vm2775_vm14, %v2767_v51, %v2783_v42 }
 0x2e4   : > { %v2792_v45 = vsel %vm2776_vm15, %v2768_v56, %v2784_v9  ;;  %v2793_v25 = vsel %vm2777_vm0, %v2769_v19, %v2785_v43  ;;  %v2794_v7 = vsel %vm2778_vm1, %v2770_v41, %v2786_v44  ;;  %v2795_v8 = vsel %vm2779_vm2, %v2771_v46, %v2787_v0  ;;  %2798 = vst.msk [vmem:[%s170_s5] sm:$0xff] %vm259_vm3, %v2790_v23 }
 0x2e5   : > { %2799 = vst.msk [vmem:[%s170_s5 + $0x8] sm:$0xff] %vm259_vm3, %v2791_v2  ;;  %v2796_v58 = vsel %vm2780_vm4, %v2772_v47, %v2788_v26  ;;  %v2797_v53 = vsel %vm2781_vm5, %v2773_v55, %v2789_v59  ;;  %2800 = vst.msk [vmem:[%s170_s5 + $0x10] sm:$0xff] %vm259_vm3, %v2792_v45 }
 0x2e6   : > { %2801 = vst.msk [vmem:[%s170_s5 + $0x18] sm:$0xff] %vm259_vm3, %v2793_v25  ;;  %2802 = vst.msk [vmem:[%s170_s5 + $0x20] sm:$0xff] %vm259_vm3, %v2794_v7 }
 0x2e7   : > { %2803 = vst.msk [vmem:[%s170_s5 + $0x28] sm:$0xff] %vm259_vm3, %v2795_v8  ;;  %2804 = vst.msk [vmem:[%s170_s5 + $0x30] sm:$0xff] %vm259_vm3, %v2796_v58 }
 0x2e8   : > { %2805 = vst.msk [vmem:[%s170_s5 + $0x38] sm:$0xff] %vm259_vm3, %v2797_v53 }
 0x2e9 PF: > { %s13_s12 = sadd.s32 1, %s3500_s12  }
 0x2ea   : > { %p10_p4 = scmp.ge.s32.totalorder %s13_s12, 4  }
 0x2ec   :  { %12 = sbr.rel (!%p10_p4) target bundleno = 1 (0x1), region = 85 }

</bundles_post_ra>
